<compile_context>
chip_gen: v6e
topology: v6e:2x2x1
jax: 0.10.0
libtpu: 0.0.40
codegen_flags: <defaults>
</compile_context>

<pallas_src>
import jax
import jax.numpy as jnp
from jax.experimental import pallas as pl
from jax.experimental.pallas import tpu as pltpu

MODEL_DIM = 768       # hardcoded in BapnaAdapter.__init__
ADAPTER_SIZE = 6      # hardcoded in BapnaAdapter.__init__
ADAPTER_PAD = 128     # bottleneck zero-padded to one lane quantum (mathematically exact)
LN_EPS = 1e-5         # torch.nn.LayerNorm default
TOKEN_TILE = 1024     # f32 token tile; ~15 MiB live VMEM incl. double-buffering


def _round_up(a, b):
    return ((a + b - 1) // b) * b


# ---------------------------------------------------------------------------
# Fused kernel on a (tm, D) token tile:
#   xn  = (x - mean) * rsqrt(var + eps)                      (LN, affine folded)
#   h   = relu(xn @ Wd' + bd')                               (768 -> 6, padded to 128)
#   out = x @ Wl + h @ (Wu @ Wl) + (bl + bu @ Wl)            (residual + wrapped Linear)
# ---------------------------------------------------------------------------
def fused_kernel(x_ref, wd_ref, bd_ref, wul_ref, wl_ref, bl_ref, o_ref):
    x = x_ref[...].astype(jnp.float32)
    inv_d = 1.0 / MODEL_DIM

    # Single-pass LayerNorm statistics: sum(x) and sum(x*x) have no data
    # dependence on each other, so the two XLU reductions overlap and the
    # centering traversal that previously fed the variance is gone.
    s1 = jnp.sum(x, axis=-1, keepdims=True)
    s2 = jnp.sum(x * x, axis=-1, keepdims=True)
    mean = s1 * inv_d
    var = s2 * inv_d - mean * mean
    xn = (x - mean) * jax.lax.rsqrt(var + LN_EPS)

    # Down-projection with folded LN affine (+ ReLU).  bf16 operands, f32 MXU acc.
    h = jnp.dot(xn.astype(jnp.bfloat16), wd_ref[...],
                preferred_element_type=jnp.float32) + bd_ref[...]
    h = jnp.maximum(h, 0.0)

    # (x + h@Wu + bu) @ Wl + bl  ==  x@Wl + h@(Wu@Wl) + (bl + bu@Wl)
    # The dominant x@Wl matmul is independent of the adapter chain, so the MXU
    # can fill while the VPU/XLU run the LN prefix.  Padded rows of Wul and
    # padded lanes of bd' are zero, so the 6->128 padding stays exact.
    out = (jnp.dot(x.astype(jnp.bfloat16), wl_ref[...],
                   preferred_element_type=jnp.float32)
           + jnp.dot(h.astype(jnp.bfloat16), wul_ref[...],
                     preferred_element_type=jnp.float32)
           + bl_ref[...])
    o_ref[...] = out.astype(o_ref.dtype)


# ---------------------------------------------------------------------------
# Wrapper
# ---------------------------------------------------------------------------
def fused_forward(x2d, wd_pad, bd_pad, wul_pad, wl_bf16, bl_eff, *, tm=TOKEN_TILE):
    """Adapter + wrapped linear on an (S, D) token slab, tiled over tokens."""
    S, D = x2d.shape

    # >= 2 grid steps whenever possible: v7x has 2 TensorCores per chip and the
    # "parallel" grid axis shards across them.  block_m is derived from
    # ceil(S / n_blocks) rounded to the 8-sublane quantum, so ragged S is not
    # padded up to a full TOKEN_TILE.
    n_blocks = max(2, pl.cdiv(S, tm))
    block_m = max(8, _round_up(pl.cdiv(S, n_blocks), 8))
    s_pad = _round_up(S, block_m)
    if s_pad != S:
        # Zero rows are safe through LN (eps keeps rsqrt finite); sliced off below.
        x2d = jnp.pad(x2d, ((0, s_pad - S), (0, 0)))

    const = lambda i: (0, 0)                   # weights/biases stay VMEM-resident
    out = pl.pallas_call(
        fused_kernel,
        out_shape=jax.ShapeDtypeStruct((s_pad, D), x2d.dtype),
        grid=(s_pad // block_m,),
        in_specs=[
            pl.BlockSpec((block_m, D), lambda i: (i, 0)),   # x token tile
            pl.BlockSpec((D, ADAPTER_PAD), const),          # Wd' = gamma*Wd   (bf16, padded)
            pl.BlockSpec((1, ADAPTER_PAD), const),          # bd' = bd+beta@Wd (f32, padded)
            pl.BlockSpec((ADAPTER_PAD, D), const),          # Wul = Wu@Wl      (bf16, padded)
            pl.BlockSpec((D, D), const),                    # Wl               (bf16)
            pl.BlockSpec((1, D), const),                    # bl' = bl+bu@Wl   (f32)
        ],
        out_specs=pl.BlockSpec((block_m, D), lambda i: (i, 0)),
        compiler_params=pltpu.CompilerParams(
            dimension_semantics=("parallel",),              # megacore-shardable
            vmem_limit_bytes=32 * 1024 * 1024),             # lift v5e 16 MiB default
    )(x2d, wd_pad, bd_pad, wul_pad, wl_bf16, bl_eff)
    return out[:S]


def prepare_params(gamma, beta, wd, bd, wu, bu, wl, bl):
    """One-time offline folds (all exact in f32) + zero-padding + bf16 casts."""
    D = MODEL_DIM
    wd_eff = gamma.reshape(D, 1) * wd                       # fold LN gamma into Wd
    bd_eff = bd.reshape(1, -1) + beta.reshape(1, D) @ wd    # fold LN beta into bd
    wul = wu @ wl                                           # (6, 768) pre-multiplied up@layer
    bl_eff = bl.reshape(1, D) + bu.reshape(1, D) @ wl       # fold bu through wrapped layer

    wd_pad = jnp.zeros((D, ADAPTER_PAD), jnp.float32).at[:, :ADAPTER_SIZE].set(wd_eff)
    bd_pad = jnp.zeros((1, ADAPTER_PAD), jnp.float32).at[:, :ADAPTER_SIZE].set(bd_eff)
    wul_pad = jnp.zeros((ADAPTER_PAD, D), jnp.float32).at[:ADAPTER_SIZE, :].set(wul)

    return dict(
        wd_pad=wd_pad.astype(jnp.bfloat16),
        bd_pad=bd_pad,
        wul_pad=wul_pad.astype(jnp.bfloat16),
        wl_bf16=wl.astype(jnp.bfloat16),
        bl_eff=bl_eff,
    )


def bapna_adaptered_forward(x, kparams):
    """x: (B, S, D).  Returns layer(adapter(x)[0].unsqueeze(0)) of shape (1, S, D)."""
    # The wrapped layer consumes only adap_out[0]; batches 1..B-1 are never used,
    # so the adapter is evaluated only on x[0].
    out = fused_forward(
        x[0],
        kparams["wd_pad"], kparams["bd_pad"],
        kparams["wul_pad"], kparams["wl_bf16"], kparams["bl_eff"],
    )
    return out[None]                                        # (1, S, D)


# ---------------------------------------------------------------------------
# Pure-JAX f32 reference (full unfolded module semantics, for a sanity check)
# ---------------------------------------------------------------------------
def reference_forward(x, p):
    mean = jnp.mean(x, axis=-1, keepdims=True)
    var = jnp.mean((x - mean) ** 2, axis=-1, keepdims=True)
    xn = (x - mean) * jax.lax.rsqrt(var + LN_EPS) * p["gamma"] + p["beta"]
    h = jnp.maximum(xn @ p["wd"] + p["bd"], 0.0)
    y = x + h @ p["wu"] + p["bu"]
    return (y[0] @ p["wl"] + p["bl"])[None]


# ---------------------------------------------------------------------------
if __name__ == "__main__":
    B, S, D = 2, 8, MODEL_DIM
    key = jax.random.PRNGKey(0)
    ks = jax.random.split(key, 10)

    x = jax.random.normal(ks[0], (B, S, D), jnp.float32)

    # Deterministic synthetic parameters (shapes follow the module's __init__).
    # Non-trivial gamma/beta so the LN-affine folding is actually exercised.
    gamma = 1.0 + 0.1 * jax.random.normal(ks[7], (1, D), jnp.float32)   # LayerNorm weight
    beta = 0.05 * jax.random.normal(ks[8], (1, D), jnp.float32)         # LayerNorm bias
    wd = jax.random.normal(ks[1], (D, ADAPTER_SIZE), jnp.float32) / jnp.sqrt(float(D))
    bd = jax.random.normal(ks[2], (ADAPTER_SIZE,), jnp.float32) * 0.01
    wu = jax.random.normal(ks[3], (ADAPTER_SIZE, D), jnp.float32) / jnp.sqrt(
        float(ADAPTER_SIZE))
    bu = jax.random.normal(ks[4], (1, D), jnp.float32) * 0.01
    # TODO(synk): the wrapped `layer` is an arbitrary nn.Module in the spec; it is
    # assumed to be nn.Linear(768, 768) here and fused as a bf16 matmul.
    wl = jax.random.normal(ks[5], (D, D), jnp.float32) / jnp.sqrt(float(D))
    bl = jax.random.normal(ks[6], (1, D), jnp.float32) * 0.01

    raw_params = dict(gamma=gamma, beta=beta, wd=wd, bd=bd, wu=wu, bu=bu, wl=wl, bl=bl)
    kparams = prepare_params(gamma, beta, wd, bd, wu, bu, wl, bl)

    out = bapna_adaptered_forward(x, kparams)
    jax.block_until_ready(out)

    ref = reference_forward(x, raw_params)
    assert out.shape == (1, S, D)
    # Tolerance sized for bf16 MXU operands with f32 accumulation (plus the exact
    # algebraic folds and the pre-multiplied Wu@Wl) vs. the f32 reference.
    assert jnp.allclose(out, ref, atol=4e-2, rtol=4e-2), float(
        jnp.max(jnp.abs(out - ref)))

    print("KERNEL_OK")
</pallas_src>

<mosaic_0001>
module attributes {stable_mosaic.version = 11 : i64} {
  func.func @fused_kernel(%arg0: i32, %arg1: memref<8x768xf32, #tpu.memory_space<vmem>>, %arg2: memref<768x128xbf16, #tpu.memory_space<vmem>>, %arg3: memref<1x128xf32, #tpu.memory_space<vmem>>, %arg4: memref<128x768xbf16, #tpu.memory_space<vmem>>, %arg5: memref<768x768xbf16, #tpu.memory_space<vmem>>, %arg6: memref<1x768xf32, #tpu.memory_space<vmem>>, %arg7: memref<8x768xf32, #tpu.memory_space<vmem>>) attributes {dimension_semantics = [#tpu.dimension_semantics<parallel>], iteration_bounds = array<i64: 1>, scalar_prefetch = 0 : i64, scratch_operands = 0 : i64, tpu.core_type = #tpu.core_type<tc>, window_params = [{transform_indices = @transform_0, window_bounds = array<i64: 8, 768>}, {pipeline_mode = #tpu.pipeline_mode<synchronous>, transform_indices = @transform_1, window_bounds = array<i64: 768, 128>}, {pipeline_mode = #tpu.pipeline_mode<synchronous>, transform_indices = @transform_2, window_bounds = array<i64: 1, 128>}, {pipeline_mode = #tpu.pipeline_mode<synchronous>, transform_indices = @transform_3, window_bounds = array<i64: 128, 768>}, {pipeline_mode = #tpu.pipeline_mode<synchronous>, transform_indices = @transform_4, window_bounds = array<i64: 768, 768>}, {pipeline_mode = #tpu.pipeline_mode<synchronous>, transform_indices = @transform_5, window_bounds = array<i64: 1, 768>}, {transform_indices = @transform_6, window_bounds = array<i64: 8, 768>}]} {
    %c0 = arith.constant 0 : index
    %c0_0 = arith.constant 0 : index
    %0 = vector.load %arg1[%c0, %c0_0] : memref<8x768xf32, #tpu.memory_space<vmem>>, vector<8x768xf32>
    %cst = arith.constant dense<0.000000e+00> : vector<8xf32>
    %1 = vector.multi_reduction <add>, %0, %cst [1] : vector<8x768xf32> to vector<8xf32>
    %2 = vector.shape_cast %1 : vector<8xf32> to vector<8x1xf32>
    %3 = arith.mulf %0, %0 : vector<8x768xf32>
    %cst_1 = arith.constant dense<0.000000e+00> : vector<8xf32>
    %4 = vector.multi_reduction <add>, %3, %cst_1 [1] : vector<8x768xf32> to vector<8xf32>
    %5 = vector.shape_cast %4 : vector<8xf32> to vector<8x1xf32>
    %cst_2 = arith.constant 0.00130208337 : f32
    %6 = vector.broadcast %cst_2 : f32 to vector<8x1xf32>
    %7 = arith.mulf %2, %6 : vector<8x1xf32>
    %cst_3 = arith.constant 0.00130208337 : f32
    %8 = vector.broadcast %cst_3 : f32 to vector<8x1xf32>
    %9 = arith.mulf %5, %8 : vector<8x1xf32>
    %10 = arith.mulf %7, %7 : vector<8x1xf32>
    %11 = arith.subf %9, %10 : vector<8x1xf32>
    %12 = vector.broadcast %7 : vector<8x1xf32> to vector<8x768xf32>
    %13 = arith.subf %0, %12 : vector<8x768xf32>
    %cst_4 = arith.constant 9.99999974E-6 : f32
    %14 = vector.broadcast %cst_4 : f32 to vector<8x1xf32>
    %15 = arith.addf %11, %14 : vector<8x1xf32>
    %16 = math.rsqrt %15 : vector<8x1xf32>
    %17 = vector.broadcast %16 : vector<8x1xf32> to vector<8x768xf32>
    %18 = arith.mulf %13, %17 : vector<8x768xf32>
    %19 = arith.truncf %18 : vector<8x768xf32> to vector<8x768xbf16>
    %c0_5 = arith.constant 0 : index
    %c0_6 = arith.constant 0 : index
    %20 = vector.load %arg2[%c0_5, %c0_6] : memref<768x128xbf16, #tpu.memory_space<vmem>>, vector<768x128xbf16>
    %cst_7 = arith.constant dense<0.000000e+00> : vector<8x128xf32>
    %21 = tpu.matmul %19, %20, %cst_7 {dimension_numbers = #tpu.dot_dimension_numbers<[1], [0], [0], [1], [0, 0, 1, 1], [], []>} : vector<8x768xbf16>, vector<768x128xbf16>, vector<8x128xf32> -> vector<8x128xf32>
    %c0_8 = arith.constant 0 : index
    %c0_9 = arith.constant 0 : index
    %22 = vector.load %arg3[%c0_8, %c0_9] : memref<1x128xf32, #tpu.memory_space<vmem>>, vector<1x128xf32>
    %23 = vector.broadcast %22 : vector<1x128xf32> to vector<8x128xf32>
    %24 = arith.addf %21, %23 : vector<8x128xf32>
    %cst_10 = arith.constant 0.000000e+00 : f32
    %25 = vector.broadcast %cst_10 : f32 to vector<8x128xf32>
    %26 = arith.maximumf %24, %25 : vector<8x128xf32>
    %27 = arith.truncf %0 : vector<8x768xf32> to vector<8x768xbf16>
    %c0_11 = arith.constant 0 : index
    %c0_12 = arith.constant 0 : index
    %28 = vector.load %arg5[%c0_11, %c0_12] : memref<768x768xbf16, #tpu.memory_space<vmem>>, vector<768x768xbf16>
    %cst_13 = arith.constant dense<0.000000e+00> : vector<8x768xf32>
    %29 = tpu.matmul %27, %28, %cst_13 {dimension_numbers = #tpu.dot_dimension_numbers<[1], [0], [0], [1], [0, 0, 1, 1], [], []>} : vector<8x768xbf16>, vector<768x768xbf16>, vector<8x768xf32> -> vector<8x768xf32>
    %30 = arith.truncf %26 : vector<8x128xf32> to vector<8x128xbf16>
    %c0_14 = arith.constant 0 : index
    %c0_15 = arith.constant 0 : index
    %31 = vector.load %arg4[%c0_14, %c0_15] : memref<128x768xbf16, #tpu.memory_space<vmem>>, vector<128x768xbf16>
    %cst_16 = arith.constant dense<0.000000e+00> : vector<8x768xf32>
    %32 = tpu.matmul %30, %31, %cst_16 {dimension_numbers = #tpu.dot_dimension_numbers<[1], [0], [0], [1], [0, 0, 1, 1], [], []>} : vector<8x128xbf16>, vector<128x768xbf16>, vector<8x768xf32> -> vector<8x768xf32>
    %33 = arith.addf %29, %32 : vector<8x768xf32>
    %c0_17 = arith.constant 0 : index
    %c0_18 = arith.constant 0 : index
    %34 = vector.load %arg6[%c0_17, %c0_18] : memref<1x768xf32, #tpu.memory_space<vmem>>, vector<1x768xf32>
    %35 = vector.broadcast %34 : vector<1x768xf32> to vector<8x768xf32>
    %36 = arith.addf %33, %35 : vector<8x768xf32>
    %c0_19 = arith.constant 0 : index
    %c0_20 = arith.constant 0 : index
    %37 = vector.load %arg7[%c0_19, %c0_20] : memref<8x768xf32, #tpu.memory_space<vmem>>, vector<8x768xf32>
    tpu.vector_store %arg7[%c0_19, %c0_20], %36 {strides = array<i32>} : memref<8x768xf32, #tpu.memory_space<vmem>>, vector<8x768xf32>,
    return
  }
  func.func @transform_0(%arg0: i32) -> (i32, i32) {
    %c0_i32 = arith.constant 0 : i32
    %c0_i32_0 = arith.constant 0 : i32
    return %arg0, %c0_i32 : i32, i32
  }
  func.func @transform_1(%arg0: i32) -> (i32, i32) {
    %c0_i32 = arith.constant 0 : i32
    %c0_i32_0 = arith.constant 0 : i32
    %c0_i32_1 = arith.constant 0 : i32
    return %c0_i32, %c0_i32_0 : i32, i32
  }
  func.func @transform_2(%arg0: i32) -> (i32, i32) {
    %c0_i32 = arith.constant 0 : i32
    %c0_i32_0 = arith.constant 0 : i32
    %c0_i32_1 = arith.constant 0 : i32
    return %c0_i32, %c0_i32_0 : i32, i32
  }
  func.func @transform_3(%arg0: i32) -> (i32, i32) {
    %c0_i32 = arith.constant 0 : i32
    %c0_i32_0 = arith.constant 0 : i32
    %c0_i32_1 = arith.constant 0 : i32
    return %c0_i32, %c0_i32_0 : i32, i32
  }
  func.func @transform_4(%arg0: i32) -> (i32, i32) {
    %c0_i32 = arith.constant 0 : i32
    %c0_i32_0 = arith.constant 0 : i32
    %c0_i32_1 = arith.constant 0 : i32
    return %c0_i32, %c0_i32_0 : i32, i32
  }
  func.func @transform_5(%arg0: i32) -> (i32, i32) {
    %c0_i32 = arith.constant 0 : i32
    %c0_i32_0 = arith.constant 0 : i32
    %c0_i32_1 = arith.constant 0 : i32
    return %c0_i32, %c0_i32_0 : i32, i32
  }
  func.func @transform_6(%arg0: i32) -> (i32, i32) {
    %c0_i32 = arith.constant 0 : i32
    %c0_i32_0 = arith.constant 0 : i32
    return %arg0, %c0_i32 : i32, i32
  }
}

</mosaic_0001>

<bundles_post_ra>
// kernel: tpu_custom_call.1
= control target key start
LH: loop header
LB: loop body
LE: loop exit
PB: predicated region body
PF: predicated region fallthrough
CT: control target
= control target key end

     0   :  { %11 = vsyncpa [#allocation3], 0  ;;  %s4602_s0 = inlined_call_operand.hbm [shape: f32[8,768], index: 0, kind: input, shape index: {}]   ;;  %s4603_s1 = inlined_call_operand.hbm [shape: bf16[768,128], index: 1, kind: input, shape index: {}]   ;;  %s4604_s2 = inlined_call_operand.hbm [shape: f32[1,128], index: 2, kind: input, shape index: {}]   ;;  %s4605_s3 = inlined_call_operand.hbm [shape: bf16[128,768], index: 3, kind: input, shape index: {}]   ;;  %s4606_s4 = inlined_call_operand.hbm [shape: bf16[768,768], index: 4, kind: input, shape index: {}]   ;;  %s4607_s5 = inlined_call_operand.hbm [shape: f32[1,768], index: 5, kind: input, shape index: {}]   ;;  %s4608_s6 = inlined_call_operand.hbm [shape: f32[8,768], index: 6, kind: output, shape index: {}]  }
   0x1   :  { %12 = vsyncpa [#allocation6], 0 }
   0x2   :  { %13 = vsyncpa [#allocation9], 0 }
   0x3   :  { %14 = vsyncpa [#allocation12], 0 }
   0x4   :  { %15 = vsyncpa [#allocation4], 0  ;;  %s4413_s21 = smov [#allocation5]  }
   0x5   :  { %s31_s22 = sshll.u32 %s4413_s21, 4  ;;  %s32_s22 = int_to_ptr.vmem [resolvable:$true] %s31_s22 }
   0x6   :  { %s4271_s23 = scalar_lea.vmem %s32_s22, 6144  ;;  %p4276_p1 = scmp.lt.s32.totalorder %s32_s22, %s32_s22 }
   0x7   :  { %p4272_p0 = scmp.ne.s32.totalorder %s32_s22, %s4271_s23  ;;  %p4277_p2 = scmp.lt.s32.totalorder %s4271_s23, %s4271_s23 }
   0x9   :  { %p4278_p3 = por %p4277_p2, %p4276_p1 }
   0xb   :  { %p4279_p4 = pnand %p4278_p3, %p4272_p0 }
   0xd   :  { %4282 = shalt.err (!%p4279_p4)
}
   0xe   :  { %s4414_s24 = smov 64   ;;  %s4415_s25 = smov 4  }
   0xf   :  { %37 = dma.hbm_to_vmem [thread:$0]  %s4603_s1, 6144, %s32_s22, [#allocation6], %s4414_s24, %s4414_s24, %s4415_s25  }
  0x10   :  { %s4416_s28 = smov [#allocation8]  }
  0x11   :  { %s53_s29 = sshll.u32 %s4416_s28, 4  ;;  %s54_s29 = int_to_ptr.vmem [resolvable:$true] %s53_s29 }
  0x12   :  { %s4291_s30 = scalar_lea.vmem %s54_s29, 6144  ;;  %p4296_p6 = scmp.lt.s32.totalorder %s54_s29, %s54_s29 }
  0x13   :  { %p4292_p5 = scmp.ne.s32.totalorder %s54_s29, %s4291_s30  ;;  %p4297_p7 = scmp.lt.s32.totalorder %s4291_s30, %s4291_s30 }
  0x15   :  { %p4298_p8 = por %p4297_p7, %p4296_p6 }
  0x17   :  { %p4299_p9 = pnand %p4298_p8, %p4292_p5 }
  0x19   :  { %4302 = shalt.err (!%p4299_p9)
}
  0x1a   :  { %s4417_s7 = smov 384   ;;  %s4418_s8 = smov 24  }
  0x1b   :  { %59 = dma.hbm_to_vmem [thread:$0]  %s4605_s3, 6144, %s54_s29, [#allocation9], %s4417_s7, %s4417_s7, %s4418_s8  }
  0x1c   :  { %s4419_s1 = smov [#allocation2]   ;;  %s4420_s12 = smov [#allocation7]  }
  0x1d   :  { %s22_s11 = sshll.u32 %s4419_s1, 4  ;;  %s44_s13 = sshll.u32 %s4420_s12, 4  ;;  %s23_s11 = int_to_ptr.vmem [resolvable:$true] %s22_s11  ;;  %s45_s13 = int_to_ptr.vmem [resolvable:$true] %s44_s13 }
  0x1e   :  { %s4311_s14 = scalar_lea.vmem %s23_s11, 768  ;;  %p4316_p11 = scmp.lt.s32.totalorder %s23_s11, %s23_s11 }
  0x1f   :  { %p4312_p10 = scmp.ne.s32.totalorder %s23_s11, %s4311_s14  ;;  %p4317_p12 = scmp.lt.s32.totalorder %s4311_s14, %s4311_s14 }
  0x21   :  { %p4318_p13 = por %p4317_p12, %p4316_p11 }
  0x23   :  { %p4319_p0 = pnand %p4318_p13, %p4312_p10 }
  0x25   :  { %4322 = shalt.err (!%p4319_p0)
}
  0x26   :  { %25 = dma.hbm_to_vmem [thread:$0]  %s4602_s0, 768, %s23_s11, [#allocation3]  }
  0x27   :  { %s4331_s17 = scalar_lea.vmem %s45_s13, 16  ;;  %s4335_s3 = scalar_lea.vmem %s45_s13, 32 }
  0x28   :  { %p4332_p1 = scmp.ne.s32.totalorder %s45_s13, %s4331_s17  ;;  %p4336_p2 = scmp.lt.s32.totalorder %s45_s13, %s45_s13 }
  0x29   :  { %p4337_p3 = scmp.lt.s32.totalorder %s4335_s3, %s4331_s17 }
  0x2b   :  { %p4338_p4 = por %p4337_p3, %p4336_p2 }
  0x2d   :  { %p4339_p5 = pnand %p4338_p4, %p4332_p1 }
  0x2f   :  { %4342 = shalt.err (!%p4339_p5)
}
  0x30   :  { %47 = dma.hbm_to_vmem [thread:$0]  %s4604_s2, 16, %s45_s13, [#allocation6]  }
  0x31   :  { %s4421_s20 = smov [#allocation10]   ;;  %s4422_s22 = smov [#allocation11]  }
  0x32   :  { %s65_s21 = sshll.u32 %s4421_s20, 4  ;;  %s78_s23 = sshll.u32 %s4422_s22, 4  ;;  %s66_s21 = int_to_ptr.vmem [resolvable:$true] %s65_s21  ;;  %s79_s23 = int_to_ptr.vmem [resolvable:$true] %s78_s23 }
  0x33   :  { %s4351_s24 = scalar_lea.vmem %s66_s21, 36864  ;;  %p4356_p7 = scmp.lt.s32.totalorder %s66_s21, %s66_s21 }
  0x34   :  { %p4352_p6 = scmp.ne.s32.totalorder %s66_s21, %s4351_s24  ;;  %p4357_p8 = scmp.lt.s32.totalorder %s4351_s24, %s4351_s24 }
  0x36   :  { %p4358_p9 = por %p4357_p8, %p4356_p7 }
  0x38   :  { %p4359_p10 = pnand %p4358_p9, %p4352_p6 }
  0x3a   :  { %4362 = shalt.err (!%p4359_p10)
}
  0x3b   :  { %71 = dma.hbm_to_vmem [thread:$0]  %s4606_s4, 36864, %s66_s21, [#allocation9], %s4417_s7, %s4417_s7, %s4418_s8  }
  0x3c   :  { %s4371_s2 = scalar_lea.vmem %s79_s23, 96  ;;  %p4376_p12 = scmp.lt.s32.totalorder %s79_s23, %s79_s23 }
  0x3d   :  { %p4372_p11 = scmp.ne.s32.totalorder %s79_s23, %s4371_s2  ;;  %p4377_p13 = scmp.lt.s32.totalorder %s4371_s2, %s4371_s2 }
  0x3f   :  { %p4378_p0 = por %p4377_p13, %p4376_p12 }
  0x41   :  { %p4379_p1 = pnand %p4378_p0, %p4372_p11 }
  0x43   :  { %4382 = shalt.err (!%p4379_p1)
}
  0x44   :  { %81 = dma.hbm_to_vmem [thread:$0]  %s4607_s5, 96, %s79_s23, [#allocation12]  }
  0x45   :  { %4403 = dma.done.wait [#allocation3], 768  }
  0x46   :  { %4404 = vsyncadd [#allocation3], 4294966528 }
  0x47   :  { %4405 = dma.done.wait [#allocation6], 6160  }
  0x48   :  { %4406 = vsyncadd [#allocation6], 4294961136 }
  0x49   :  { %4407 = dma.done.wait [#allocation9], 43008  }
  0x4a   :  { %4408 = vsyncadd [#allocation9], 4294924288 }
  0x4b   :  { %4409 = dma.done.wait [#allocation12], 96  }
  0x4c   :  { %4410 = vsyncadd [#allocation12], 4294967200  ;;  %v101_v0 = vld [vmem:[#allocation2] sm:$0xff]  ;;  %v102_v1 = vld [vmem:[#allocation2 + $0x8] sm:$0xff]  ;;  %s4424_s4 = smov [#allocation13]  }
  0x4d   :  { %v103_v2 = vld [vmem:[#allocation2 + $0x10] sm:$0xff]  ;;  %v104_v3 = vld [vmem:[#allocation2 + $0x18] sm:$0xff]  ;;  %v107_v4 = vadd.f32 %v102_v1, %v101_v0  ;;  %v114_v5 = vmul.f32 %v101_v0, %v101_v0  ;;  %v115_v6 = vmul.f32 %v102_v1, %v102_v1  ;;  %v105_v8 = vld [vmem:[#allocation2 + $0x20] sm:$0xff]  ;;  %s3228_s5 = sshll.u32 %s4424_s4, 4  ;;  %s3229_s5 = int_to_ptr.vmem [resolvable:$true] %s3228_s5 }
  0x4e   :  { %v116_v7 = vmul.f32 %v103_v2, %v103_v2  ;;  %v3703_v9 = vld [vmem:[#allocation5 + $0x78] sm:$0xff]   ;;  %v117_v11 = vmul.f32 %v104_v3, %v104_v3  ;;  %v118_v17 = vmul.f32 %v105_v8, %v105_v8  ;;  %v3707_v26 = vld [vmem:[#allocation5 + $0x70] sm:$0xff]   ;;  %v3711_v30 = vld [vmem:[#allocation5 + $0x68] sm:$0xff]   ;;  %s4383_s28 = scalar_lea.vmem %s3229_s5, 768  ;;  %p4388_p3 = scmp.lt.s32.totalorder %s3229_s5, %s3229_s5 }
  0x4f   :  { %v108_v10 = vadd.f32 %v107_v4, %v103_v2  ;;  %v120_v12 = vadd.f32 %v115_v6, %v114_v5  ;;  %v3704_v13 = vld [vmem:[#allocation5 + $0x38] sm:$0xff]   ;;  %3625 = vmatprep.subr.bf16.mxu1 %v3703_v9  ;;  %v3708_v27 = vld [vmem:[#allocation5 + $0x30] sm:$0xff]   ;;  %v3712_v31 = vld [vmem:[#allocation5 + $0x28] sm:$0xff]   ;;  %p4384_p2 = scmp.ne.s32.totalorder %s3229_s5, %s4383_s28  ;;  %p4389_p4 = scmp.lt.s32.totalorder %s4383_s28, %s4383_s28 }
  0x50   :  { %v106_v14 = vld [vmem:[#allocation2 + $0x28] sm:$0xff]  ;;  %3626 = vmatpush3.bf16.msra.mxu1 %v3704_v13  ;;  %v3709_v28 = vld [vmem:[#allocation5 + $0x170] sm:$0xff]   ;;  %v3713_v32 = vld [vmem:[#allocation5 + $0x168] sm:$0xff]  }
  0x51   :  { %v3705_v15 = vld [vmem:[#allocation5 + $0x178] sm:$0xff]   ;;  %v109_v16 = vadd.f32 %v108_v10, %v104_v3  ;;  %v121_v18 = vadd.f32 %v120_v12, %v116_v7  ;;  %v119_v21 = vmul.f32 %v106_v14, %v106_v14  ;;  %3627 = vmatprep.subr.bf16.mxu1 %v3707_v26  ;;  %v3710_v29 = vld [vmem:[#allocation5 + $0x130] sm:$0xff]   ;;  %v3714_v33 = vld [vmem:[#allocation5 + $0x128] sm:$0xff]   ;;  %p4390_p5 = por %p4389_p4, %p4388_p3 }
  0x52   :  { %v3706_v19 = vld [vmem:[#allocation5 + $0x138] sm:$0xff]   ;;  %3669 = vmatprep.subr.bf16.mxu0 %v3705_v15  ;;  %v3715_v34 = vld [vmem:[#allocation5 + $0x60] sm:$0xff]   ;;  %v3723_v42 = vld [vmem:[#allocation5 + $0x50] sm:$0xff]  }
  0x53   :  { %v110_v20 = vadd.f32 %v109_v16, %v105_v8  ;;  %v122_v22 = vadd.f32 %v121_v18, %v117_v11  ;;  %3670 = vmatpush3.bf16.msra.mxu0 %v3706_v19  ;;  %v3716_v35 = vld [vmem:[#allocation5 + $0x20] sm:$0xff]   ;;  %v3719_v38 = vld [vmem:[#allocation5 + $0x58] sm:$0xff]   ;;  %v3725_v43 = vld [vmem:[#allocation5 + $0x150] sm:$0xff]   ;;  %p4391_p6 = pnand %p4390_p5, %p4384_p2 }
  0x54   :  { %3628 = vmatpush3.bf16.msra.mxu1 %v3708_v27  ;;  %3671 = vmatprep.subr.bf16.mxu0 %v3709_v28  ;;  %v3717_v36 = vld [vmem:[#allocation5 + $0x160] sm:$0xff]   ;;  %v3720_v39 = vld [vmem:[#allocation5 + $0x18] sm:$0xff]   ;;  %v3724_v44 = vld [vmem:[#allocation5 + $0x10] sm:$0xff]  }
  0x55   :  { %v111_v23 = vadd.f32 %v110_v20, %v106_v14  ;;  %v123_v24 = vadd.f32 %v122_v22, %v118_v17  ;;  %3629 = vmatprep.subr.bf16.mxu1 %v3711_v30  ;;  %v3718_v37 = vld [vmem:[#allocation5 + $0x120] sm:$0xff]   ;;  %v3721_v40 = vld [vmem:[#allocation5 + $0x158] sm:$0xff]   ;;  %v3726_v45 = vld [vmem:[#allocation5 + $0x110] sm:$0xff]  }
  0x56   :  { %v3722_v41 = vld [vmem:[#allocation5 + $0x118] sm:$0xff]   ;;  %v3727_v46 = vld [vmem:[#allocation5 + $0x48] sm:$0xff]   ;;  %v3731_v50 = vld [vmem:[#allocation5 + $0x40] sm:$0xff]  }
  0x57   :  { %112 = vadd.xlane.f32.xlu0 %v111_v23  ;;  %v124_v25 = vadd.f32 %v123_v24, %v119_v21  ;;  %3672 = vmatpush3.bf16.msra.mxu0 %v3710_v29  ;;  %v3728_v47 = vld [vmem:[#allocation5 + $0x8] sm:$0xff]   ;;  %v3733_v51 = vld [vmem:[#allocation5 + $0x140] sm:$0xff]   ;;  %v3735_v54 = vld [vmem:[#allocation5 + $0xf8] sm:$0xff]  }
  0x58   :  { %3630 = vmatpush3.bf16.msra.mxu1 %v3712_v31  ;;  %3673 = vmatprep.subr.bf16.mxu0 %v3713_v32  ;;  %v3729_v48 = vld [vmem:[#allocation5 + $0x148] sm:$0xff]   ;;  %v3732_v52 = vld [vmem:[#allocation5] sm:$0xff]   ;;  %v4488_v62 = vld [vmem:[#allocation2 + $0x8] sm:$0xff] }
  0x59   :  { %3631 = vmatprep.subr.bf16.mxu1 %v3715_v34  ;;  %v3730_v49 = vld [vmem:[#allocation5 + $0x108] sm:$0xff]   ;;  %v3734_v53 = vld [vmem:[#allocation5 + $0x100] sm:$0xff]   ;;  %v4492_v0 = vld [vmem:[#allocation2 + $0x28] sm:$0xff] }
  0x5a   :  { %v4496_v2 = vld [vmem:[#allocation2] sm:$0xff]  ;;  %v4504_v7 = vld [vmem:[#allocation2 + $0x18] sm:$0xff]  ;;  %v3736_v17 = vld [vmem:[#allocation5 + $0xb8] sm:$0xff]  }
  0x5b   :  { %125 = vadd.xlane.f32.xlu0 %v124_v25  ;;  %3674 = vmatpush3.bf16.msra.mxu0 %v3714_v33  ;;  %v4500_v4 = vld [vmem:[#allocation2 + $0x20] sm:$0xff]  ;;  %v3739_v22 = vld [vmem:[#allocation5 + $0xe8] sm:$0xff]   ;;  %v3741_v24 = vld [vmem:[#allocation5 + $0xe0] sm:$0xff]  }
  0x5c   :  { %3632 = vmatpush3.bf16.msra.mxu1 %v3716_v35  ;;  %3675 = vmatprep.subr.bf16.mxu0 %v3717_v36  ;;  %v3737_v19 = vld [vmem:[#allocation5 + $0xf0] sm:$0xff]   ;;  %v3740_v23 = vld [vmem:[#allocation5 + $0xa8] sm:$0xff]   ;;  %v3742_v25 = vld [vmem:[#allocation5 + $0xa0] sm:$0xff]  }
  0x5d   :  { %3633 = vmatprep.subr.bf16.mxu1 %v3719_v38  ;;  %v3738_v21 = vld [vmem:[#allocation5 + $0xb0] sm:$0xff]   ;;  %v3743_v26 = vld [vmem:[#allocation5 + $0xd8] sm:$0xff]   ;;  %v3747_v30 = vld [vmem:[#allocation5 + $0xc8] sm:$0xff]  }
  0x5e   :  { %v3744_v27 = vld [vmem:[#allocation5 + $0x98] sm:$0xff]   ;;  %v3745_v28 = vld [vmem:[#allocation5 + $0xd0] sm:$0xff]   ;;  %v3748_v31 = vld [vmem:[#allocation5 + $0x88] sm:$0xff]  }
  0x5f   :  { %3676 = vmatpush3.bf16.msra.mxu0 %v3718_v37  ;;  %v3746_v29 = vld [vmem:[#allocation5 + $0x90] sm:$0xff]   ;;  %v3749_v32 = vld [vmem:[#allocation5 + $0xc0] sm:$0xff]  }
  0x60   :  { %3677 = vmatprep.subr.bf16.mxu0 %v3721_v40  ;;  %3634 = vmatpush3.bf16.msra.mxu1 %v3720_v39  ;;  %v4508_v33 = vld [vmem:[#allocation2 + $0x10] sm:$0xff]  ;;  %v3751_v38 = vld [vmem:[#allocation8 + $0x150] ss:$24 sps:$4 sm:$0xff]   ;;  %v3753_v39 = vld [vmem:[#allocation8 + $0x154] ss:$24 sps:$4 sm:$0xff]  }
  0x61   :  { %3635 = vmatprep.subr.bf16.mxu1 %v3723_v42  ;;  %v3750_v35 = vld [vmem:[#allocation5 + $0x80] sm:$0xff]   ;;  %v3754_v40 = vld [vmem:[#allocation8 + $0x158] ss:$24 sps:$4 sm:$0xff]  }
  0x62   :  { %v3759_v42 = vld [vmem:[#allocation8 + $0x124] ss:$24 sps:$4 sm:$0xff]  }
  0x63   :  { %3678 = vmatpush3.bf16.msra.mxu0 %v3722_v41  ;;  %v3756_v41 = vld [vmem:[#allocation8 + $0x15c] ss:$24 sps:$4 sm:$0xff]  }
  0x64   :  { %3679 = vmatprep.subr.bf16.mxu0 %v3725_v43  ;;  %3636 = vmatpush3.bf16.msra.mxu1 %v3724_v44  ;;  %v3762_v43 = vld [vmem:[#allocation8 + $0x12c] ss:$24 sps:$4 sm:$0xff]   ;;  %v3757_v44 = vld [vmem:[#allocation8 + $0x120] ss:$24 sps:$4 sm:$0xff]  }
  0x65   :  { %3637 = vmatprep.subr.bf16.mxu1 %v3727_v46  ;;  %v3765_v46 = vld [vmem:[#allocation8 + $0xf4] ss:$24 sps:$4 sm:$0xff]  }
  0x67   :  { %3680 = vmatpush3.bf16.msra.mxu0 %v3726_v45  ;;  %v3760_v45 = vld [vmem:[#allocation8 + $0x128] ss:$24 sps:$4 sm:$0xff]  }
  0x68   :  { %3681 = vmatprep.subr.bf16.mxu0 %v3729_v48  ;;  %3638 = vmatpush3.bf16.msra.mxu1 %v3728_v47  ;;  %v3768_v47 = vld [vmem:[#allocation8 + $0xfc] ss:$24 sps:$4 sm:$0xff]   ;;  %v3763_v48 = vld [vmem:[#allocation8 + $0xf0] ss:$24 sps:$4 sm:$0xff]  }
  0x69   :  { %3639 = vmatprep.subr.bf16.mxu1 %v3731_v50  ;;  %v3771_v50 = vld [vmem:[#allocation8 + $0xc4] ss:$24 sps:$4 sm:$0xff]  }
  0x6b   :  { %3682 = vmatpush3.bf16.msra.mxu0 %v3730_v49  ;;  %v3766_v49 = vld [vmem:[#allocation8 + $0xf8] ss:$24 sps:$4 sm:$0xff]  }
  0x6c   :  { %3683 = vmatprep.subr.bf16.mxu0 %v3733_v51  ;;  %3640 = vmatpush3.bf16.msra.mxu1 %v3732_v52  ;;  %v3774_v51 = vld [vmem:[#allocation8 + $0xcc] ss:$24 sps:$4 sm:$0xff]   ;;  %v3769_v52 = vld [vmem:[#allocation8 + $0xc0] ss:$24 sps:$4 sm:$0xff]  }
  0x6d   :  { %3647 = vmatprep.subr.bf16.mxu1 %v3735_v54  ;;  %v3777_v54 = vld [vmem:[#allocation8 + $0x94] ss:$24 sps:$4 sm:$0xff]  }
  0x6f   :  { %3684 = vmatpush3.bf16.msra.mxu0 %v3734_v53  ;;  %v3772_v53 = vld [vmem:[#allocation8 + $0xc8] ss:$24 sps:$4 sm:$0xff]  }
  0x70   :  { %1287 = vmatprep.subr.bf16.mxu0 %v3756_v41  ;;  %v3805_v41 = vld [vmem:[#allocation8 + $0x130] ss:$24 sps:$4 sm:$0xff]  }
  0xe0   :  { %v113_v55 = vpop.xlane.xlu0 %112 }
  0xe1   :  { %v4484_v56 = vmul.f32 0.0013020834, %v113_v55  ;;  %v3780_v55 = vld [vmem:[#allocation8 + $0x9c] ss:$24 sps:$4 sm:$0xff]  }
  0xe3   :  { %v129_v58 = vmul.f32 %v4484_v56, %v4484_v56  ;;  %v132_v63 = vsub.f32 %v4488_v62, %v4484_v56  ;;  %v136_v1 = vsub.f32 %v4492_v0, %v4484_v56  ;;  %v131_v3 = vsub.f32 %v4496_v2, %v4484_v56 }
  0xe4   :  { %v126_v57 = vpop.xlane.xlu0 %125  ;;  %v135_v5 = vsub.f32 %v4500_v4, %v4484_v56  ;;  %v134_v8 = vsub.f32 %v4504_v7, %v4484_v56  ;;  %v133_v34 = vsub.f32 %v4508_v33, %v4484_v56  ;;  %v3775_v56 = vld [vmem:[#allocation8 + $0x90] ss:$24 sps:$4 sm:$0xff]  }
  0xe5   :  { %v128_v59 = vmul.f32 0.0013020834, %v126_v57  ;;  %v3778_v57 = vld [vmem:[#allocation8 + $0x98] ss:$24 sps:$4 sm:$0xff]  }
  0xe7   :  { %v130_v60 = vsub.f32 %v128_v59, %v129_v58  ;;  %v3783_v58 = vld [vmem:[#allocation8 + $0x64] ss:$24 sps:$4 sm:$0xff]  }
  0xe8   :  { %v3786_v59 = vld [vmem:[#allocation8 + $0x6c] ss:$24 sps:$4 sm:$0xff]  }
  0xe9   :  { %v137_v61 = vadd.f32 1e-05, %v130_v60  ;;  %v3781_v60 = vld [vmem:[#allocation8 + $0x60] ss:$24 sps:$4 sm:$0xff]  }
  0xeb   :  { %4255 = vrsqrt.f32 %v137_v61  ;;  %v3784_v61 = vld [vmem:[#allocation8 + $0x68] ss:$24 sps:$4 sm:$0xff]  }
  0xf8   :  { %v4256_v6 = vpop.eup %4255 }
  0xf9   :  { %v140_v9 = vmul.f32 %v4256_v6, %v132_v63  ;;  %v144_v10 = vmul.f32 %v4256_v6, %v136_v1  ;;  %v139_v11 = vmul.f32 %v4256_v6, %v131_v3  ;;  %v143_v12 = vmul.f32 %v4256_v6, %v135_v5  ;;  %v3789_v63 = vld [vmem:[#allocation8 + $0x34] ss:$24 sps:$4 sm:$0xff]   ;;  %v3787_v3 = vld [vmem:[#allocation8 + $0x30] ss:$24 sps:$4 sm:$0xff]  }
  0xfa   :  { %v142_v13 = vmul.f32 %v4256_v6, %v134_v8  ;;  %v141_v36 = vmul.f32 %v4256_v6, %v133_v34  ;;  %v3792_v1 = vld [vmem:[#allocation8 + $0x3c] ss:$24 sps:$4 sm:$0xff]   ;;  %v3790_v5 = vld [vmem:[#allocation8 + $0x38] ss:$24 sps:$4 sm:$0xff]   ;;  %v3798_v8 = vld [vmem:[#allocation8 + $0xc] ss:$24 sps:$4 sm:$0xff]  }
  0xfb   :  { %v146_v14 = vpack.c.bf16 %v140_v9, %v140_v9  ;;  %v150_v15 = vpack.c.bf16 %v144_v10, %v144_v10  ;;  %v145_v16 = vpack.c.bf16 %v139_v11, %v139_v11  ;;  %v149_v18 = vpack.c.bf16 %v143_v12, %v143_v12  ;;  %v3795_v6 = vld [vmem:[#allocation8 + $0x4] ss:$24 sps:$4 sm:$0xff]   ;;  %v3793_v9 = vld [vmem:[#allocation8] ss:$24 sps:$4 sm:$0xff]   ;;  %v3804_v12 = vld [vmem:[#allocation10 + $0x154] ss:$24 sps:$4 sm:$0xff]  }
  0xfc   :  { %v148_v20 = vpack.c.bf16 %v142_v13, %v142_v13  ;;  %v147_v37 = vpack.c.bf16 %v141_v36, %v141_v36  ;;  %v3796_v10 = vld [vmem:[#allocation8 + $0x8] ss:$24 sps:$4 sm:$0xff]   ;;  %v3801_v11 = vld [vmem:[#allocation8 + $0x164] ss:$24 sps:$4 sm:$0xff]   ;;  %v4423_v13 = vmov 0  }
  0xfd   :  { %574 = vmatprep.mubr.bf16.mxu1 %v146_v14  ;;  %654 = vmatprep.mubr.bf16.mxu0 %v150_v15  ;;  %v3802_v36 = vld [vmem:[#allocation10 + $0x150] ss:$24 sps:$4 sm:$0xff]  }
  0xfe   :  { %575 = vmatmul.mubr.bf16.vlgmr.msra.gmra.mxu1 %v145_v16  ;;  %655 = vmatmul.mubr.bf16.vlgmr.msra.gmra.mxu0 %v149_v18 }
  0xff   :  { %3648 = vmatpush3.bf16.msra.mxu1 %v3736_v17  ;;  %614 = vmatprep.mubr.bf16.mxu1 %v148_v20 }
 0x100   :  { %3649 = vmatprep.subr.bf16.mxu1 %v3737_v19  ;;  %1288 = vmatpush1.bf16.msra.mxu0 %v3754_v40  ;;  %v4516_v40 = vpack.c.bf16 %v4488_v62, %v4488_v62  ;;  %v3814_v62 = vld [vmem:[#allocation10 + $0xf0] ss:$24 sps:$4 sm:$0xff]  }
 0x101   :  { %1289 = vmatprep.subr.bf16.mxu0 %v3762_v43  ;;  %1319 = vmatprep.mubr.bf16.mxu0 %v4423_v13  ;;  %v3813_v43 = vld [vmem:[#allocation8 + $0x104] ss:$24 sps:$4 sm:$0xff]  }
 0x103   :  { %3650 = vmatpush3.bf16.msra.mxu1 %v3738_v21 }
 0x104   :  { %3651 = vmatprep.subr.bf16.mxu1 %v3739_v22  ;;  %1290 = vmatpush1.bf16.msra.mxu0 %v3760_v45  ;;  %v3811_v45 = vld [vmem:[#allocation8 + $0x100] ss:$24 sps:$4 sm:$0xff]  }
 0x105   :  { %1291 = vmatprep.subr.bf16.mxu0 %v3768_v47  ;;  %v3822_v47 = vld [vmem:[#allocation10 + $0xc4] ss:$24 sps:$4 sm:$0xff]  }
 0x107   :  { %3652 = vmatpush3.bf16.msra.mxu1 %v3740_v23  ;;  %v3240_v23 = vld [vmem:[#allocation7] ss:$0 sm:$0xff] }
 0x108   :  { %3653 = vmatprep.subr.bf16.mxu1 %v3741_v24  ;;  %1292 = vmatpush1.bf16.msra.mxu0 %v3766_v49  ;;  %v3820_v49 = vld [vmem:[#allocation10 + $0xc0] ss:$24 sps:$4 sm:$0xff]  }
 0x109   :  { %1293 = vmatprep.subr.bf16.mxu0 %v3774_v51  ;;  %v3828_v51 = vld [vmem:[#allocation10 + $0x94] ss:$24 sps:$4 sm:$0xff]  }
 0x10b   :  { %3654 = vmatpush3.bf16.msra.mxu1 %v3742_v25 }
 0x10c   :  { %3655 = vmatprep.subr.bf16.mxu1 %v3743_v26  ;;  %1294 = vmatpush1.bf16.msra.mxu0 %v3772_v53  ;;  %v3826_v53 = vld [vmem:[#allocation10 + $0x90] ss:$24 sps:$4 sm:$0xff]  }
 0x10d   :  { %1295 = vmatprep.subr.bf16.mxu0 %v3780_v55  ;;  %v3834_v55 = vld [vmem:[#allocation10 + $0x64] ss:$24 sps:$4 sm:$0xff]  }
 0x10f   :  { %3656 = vmatpush3.bf16.msra.mxu1 %v3744_v27 }
 0x110   :  { %3657 = vmatprep.subr.bf16.mxu1 %v3745_v28  ;;  %1296 = vmatpush1.bf16.msra.mxu0 %v3778_v57  ;;  %v3832_v57 = vld [vmem:[#allocation10 + $0x60] ss:$24 sps:$4 sm:$0xff]  }
 0x111   :  { %1297 = vmatprep.subr.bf16.mxu0 %v3786_v59  ;;  %v3840_v59 = vld [vmem:[#allocation10 + $0x34] ss:$24 sps:$4 sm:$0xff]  }
 0x113   :  { %3658 = vmatpush3.bf16.msra.mxu1 %v3746_v29 }
 0x114   :  { %3659 = vmatprep.subr.bf16.mxu1 %v3747_v30  ;;  %1298 = vmatpush1.bf16.msra.mxu0 %v3784_v61  ;;  %v3838_v61 = vld [vmem:[#allocation10 + $0x30] ss:$24 sps:$4 sm:$0xff]  }
 0x115   :  { %1299 = vmatprep.subr.bf16.mxu0 %v3792_v1  ;;  %v3846_v1 = vld [vmem:[#allocation10 + $0x4] ss:$24 sps:$4 sm:$0xff]  }
 0x117   :  { %3660 = vmatpush3.bf16.msra.mxu1 %v3748_v31 }
 0x118   :  { %3661 = vmatprep.subr.bf16.mxu1 %v3749_v32  ;;  %1300 = vmatpush1.bf16.msra.mxu0 %v3790_v5  ;;  %v3844_v5 = vld [vmem:[#allocation10] ss:$24 sps:$4 sm:$0xff]  }
 0x119   :  { %1301 = vmatprep.subr.bf16.mxu0 %v3798_v8  ;;  %v3852_v8 = vld [vmem:[#allocation10 + $0x454] ss:$24 sps:$4 sm:$0xff]  }
 0x11b   :  { %3662 = vmatpush3.bf16.msra.mxu1 %v3750_v35  ;;  %v3799_v35 = vld [vmem:[#allocation8 + $0x160] ss:$24 sps:$4 sm:$0xff]  }
 0x11c   :  { %1246 = vmatprep.subr.bf16.mxu1 %v3753_v39  ;;  %1302 = vmatpush1.bf16.msra.mxu0 %v3796_v10  ;;  %v3810_v39 = vld [vmem:[#allocation10 + $0x124] ss:$24 sps:$4 sm:$0xff]   ;;  %v3850_v10 = vld [vmem:[#allocation10 + $0x450] ss:$24 sps:$4 sm:$0xff]  }
 0x11d   :  { %2809 = vmatprep.subr.bf16.mxu0 %v3804_v12  ;;  %v3858_v12 = vld [vmem:[#allocation10 + $0x424] ss:$24 sps:$4 sm:$0xff]  }
 0x11e   :  { %615 = vmatmul.mubr.bf16.vlgmr.msra.gmra.mxu1 %v147_v37 }
 0x11f   :  { %1247 = vmatpush1.bf16.msra.mxu1 %v3751_v38  ;;  %1278 = vmatprep.mubr.bf16.mxu1 %v4423_v13  ;;  %v3807_v38 = vld [vmem:[#allocation8 + $0x134] ss:$24 sps:$4 sm:$0xff]  }
 0x120   :  { %1248 = vmatprep.subr.bf16.mxu1 %v3759_v42  ;;  %v3808_v42 = vld [vmem:[#allocation10 + $0x120] ss:$24 sps:$4 sm:$0xff]  }
 0x123   :  { %1249 = vmatpush1.bf16.msra.mxu1 %v3757_v44  ;;  %v3816_v44 = vld [vmem:[#allocation10 + $0xf4] ss:$24 sps:$4 sm:$0xff]  }
 0x124   :  { %1250 = vmatprep.subr.bf16.mxu1 %v3765_v46  ;;  %v3819_v46 = vld [vmem:[#allocation8 + $0xd4] ss:$24 sps:$4 sm:$0xff]  }
 0x127   :  { %1251 = vmatpush1.bf16.msra.mxu1 %v3763_v48  ;;  %v3817_v48 = vld [vmem:[#allocation8 + $0xd0] ss:$24 sps:$4 sm:$0xff]  }
 0x128   :  { %1252 = vmatprep.subr.bf16.mxu1 %v3771_v50  ;;  %v3825_v50 = vld [vmem:[#allocation8 + $0xa4] ss:$24 sps:$4 sm:$0xff]  }
 0x12b   :  { %1253 = vmatpush1.bf16.msra.mxu1 %v3769_v52  ;;  %v3823_v52 = vld [vmem:[#allocation8 + $0xa0] ss:$24 sps:$4 sm:$0xff]  }
 0x12c   :  { %1254 = vmatprep.subr.bf16.mxu1 %v3777_v54  ;;  %v3831_v54 = vld [vmem:[#allocation8 + $0x74] ss:$24 sps:$4 sm:$0xff]  }
 0x12f   :  { %1255 = vmatpush1.bf16.msra.mxu1 %v3775_v56  ;;  %v3829_v56 = vld [vmem:[#allocation8 + $0x70] ss:$24 sps:$4 sm:$0xff]  }
 0x130   :  { %1256 = vmatprep.subr.bf16.mxu1 %v3783_v58  ;;  %v3837_v58 = vld [vmem:[#allocation8 + $0x44] ss:$24 sps:$4 sm:$0xff]  }
 0x133   :  { %1257 = vmatpush1.bf16.msra.mxu1 %v3781_v60  ;;  %v3835_v60 = vld [vmem:[#allocation8 + $0x40] ss:$24 sps:$4 sm:$0xff]  }
 0x134   :  { %1258 = vmatprep.subr.bf16.mxu1 %v3789_v63  ;;  %v3843_v63 = vld [vmem:[#allocation8 + $0x14] ss:$24 sps:$4 sm:$0xff]  }
 0x137   :  { %1259 = vmatpush1.bf16.msra.mxu1 %v3787_v3  ;;  %v3841_v3 = vld [vmem:[#allocation8 + $0x10] ss:$24 sps:$4 sm:$0xff]  }
 0x138   :  { %1260 = vmatprep.subr.bf16.mxu1 %v3795_v6  ;;  %v3849_v6 = vld [vmem:[#allocation10 + $0x2d4] ss:$24 sps:$4 sm:$0xff]  }
 0x13b   :  { %1261 = vmatpush1.bf16.msra.mxu1 %v3793_v9  ;;  %v3847_v9 = vld [vmem:[#allocation10 + $0x2d0] ss:$24 sps:$4 sm:$0xff]  }
 0x13c   :  { %1328 = vmatprep.subr.bf16.mxu1 %v3801_v11  ;;  %v3855_v11 = vld [vmem:[#allocation10 + $0x2a4] ss:$24 sps:$4 sm:$0xff]  }
 0x1be   :  { %v3641_v14 = vpop.f32.mrf.mxu1  ;;  %v3685_v15 = vpop.f32.mrf.mxu0 }
 0x1c0   :  { %v3642_v16 = vpop.f32.mrf.mxu1  ;;  %v3686_v17 = vpop.f32.mrf.mxu0 }
 0x1c1   :  { %v3643_v22 = vadd.f32 %v3642_v16, %v3641_v14  ;;  %v3687_v29 = vadd.f32 %v3686_v17, %v3685_v15  ;;  %v3853_v14 = vld [vmem:[#allocation10 + $0x2a0] ss:$24 sps:$4 sm:$0xff]   ;;  %v3861_v16 = vld [vmem:[#allocation10 + $0x274] ss:$24 sps:$4 sm:$0xff]  }
 0x1c2   :  { %v3644_v18 = vpop.f32.mrf.mxu1  ;;  %v3688_v19 = vpop.f32.mrf.mxu0  ;;  %v3856_v15 = vld [vmem:[#allocation10 + $0x420] ss:$24 sps:$4 sm:$0xff]   ;;  %v3864_v17 = vld [vmem:[#allocation10 + $0x3f4] ss:$24 sps:$4 sm:$0xff]  }
 0x1c3   :  { %v577_v26 = vadd.f32 %v3643_v22, %v3240_v23  ;;  %v3859_v18 = vld [vmem:[#allocation10 + $0x270] ss:$24 sps:$4 sm:$0xff]   ;;  %v3868_v22 = vld [vmem:[#allocation10 + $0x3c0] ss:$24 sps:$4 sm:$0xff]   ;;  %v3873_v23 = vld [vmem:[#allocation10 + $0x214] ss:$24 sps:$4 sm:$0xff]  }
 0x1c4   :  { %v3645_v20 = vpop.f32.mrf.mxu1  ;;  %v3689_v21 = vpop.f32.mrf.mxu0  ;;  %v3862_v19 = vld [vmem:[#allocation10 + $0x3f0] ss:$24 sps:$4 sm:$0xff]  }
 0x1c5   :  { %v3870_v20 = vld [vmem:[#allocation10 + $0x3c4] ss:$24 sps:$4 sm:$0xff]   ;;  %v3865_v21 = vld [vmem:[#allocation10 + $0x240] ss:$24 sps:$4 sm:$0xff]  }
 0x1de   :  { %v3663_v24 = vpop.f32.mrf.mxu1 }
 0x1e0   :  { %v3664_v25 = vpop.f32.mrf.mxu1 }
 0x1e1   :  { %v3665_v27 = vadd.f32 %v3664_v25, %v3663_v24  ;;  %v3876_v24 = vld [vmem:[#allocation10 + $0x394] ss:$24 sps:$4 sm:$0xff]   ;;  %v3871_v25 = vld [vmem:[#allocation10 + $0x210] ss:$24 sps:$4 sm:$0xff]  }
 0x1e2   :  { %v3666_v28 = vpop.f32.mrf.mxu1 }
 0x1e3   :  { %v617_v30 = vadd.f32 %v3665_v27, %v577_v26  ;;  %v3874_v26 = vld [vmem:[#allocation10 + $0x390] ss:$24 sps:$4 sm:$0xff]   ;;  %v3879_v27 = vld [vmem:[#allocation10 + $0x1e4] ss:$24 sps:$4 sm:$0xff]  }
 0x1e4   :  { %v3667_v31 = vpop.f32.mrf.mxu1  ;;  %v3882_v28 = vld [vmem:[#allocation10 + $0x364] ss:$24 sps:$4 sm:$0xff]  }
 0x1e5   :  { %v657_v32 = vadd.f32 %v3687_v29, %v617_v30  ;;  %v3877_v29 = vld [vmem:[#allocation10 + $0x1e0] ss:$24 sps:$4 sm:$0xff]   ;;  %v3885_v31 = vld [vmem:[#allocation10 + $0x1b4] ss:$24 sps:$4 sm:$0xff]  }
 0x1e6   :  { %v3880_v30 = vld [vmem:[#allocation10 + $0x360] ss:$24 sps:$4 sm:$0xff]  }
 0x1e7   :  { %v662_v34 = vmax.f32 %v657_v32, 0.0  ;;  %v3888_v32 = vld [vmem:[#allocation10 + $0x334] ss:$24 sps:$4 sm:$0xff]  }
 0x1e9   :  { %v4512_v37 = vpack.c.bf16 %v662_v34, %v662_v34  ;;  %v3883_v34 = vld [vmem:[#allocation10 + $0x1b0] ss:$24 sps:$4 sm:$0xff]  }
 0x1eb   :  { %1279 = vmatmul.mubr.bf16.vlgmr.msra.gmra.mxu1 %v4512_v37  ;;  %1320 = vmatmul.mubr.bf16.vlgmr.msra.gmra.mxu0 %v4512_v37 }
 0x1ec   :  { %1329 = vmatpush1.bf16.msra.mxu1 %v3799_v35  ;;  %2810 = vmatpush1.bf16.msra.mxu0 %v3802_v36  ;;  %v3886_v35 = vld [vmem:[#allocation10 + $0x330] ss:$24 sps:$4 sm:$0xff]   ;;  %v3891_v36 = vld [vmem:[#allocation10 + $0x184] ss:$24 sps:$4 sm:$0xff]  }
 0x1ed   :  { %1330 = vmatprep.subr.bf16.mxu1 %v3807_v38  ;;  %2811 = vmatprep.subr.bf16.mxu0 %v3810_v39  ;;  %v3889_v38 = vld [vmem:[#allocation10 + $0x180] ss:$24 sps:$4 sm:$0xff]  }
 0x1ee   :  { %1360 = vmatprep.mubr.bf16.mxu1 %v4423_v13  ;;  %2841 = vmatprep.mubr.bf16.mxu0 %v4516_v40  ;;  %v4523_v13 = vpack.c.bf16 %v4504_v7, %v4504_v7  ;;  %v3867_v7 = vld [vmem:[#allocation10 + $0x244] ss:$24 sps:$4 sm:$0xff]   ;;  %v3892_v39 = vld [vmem:[#allocation10 + $0x300] ss:$24 sps:$4 sm:$0xff]  }
 0x1f0   :  { %1331 = vmatpush1.bf16.msra.mxu1 %v3805_v41  ;;  %2812 = vmatpush1.bf16.msra.mxu0 %v3808_v42  ;;  %v3897_v41 = vld [vmem:[#allocation10 + $0x5d4] ss:$24 sps:$4 sm:$0xff]  }
 0x1f1   :  { %1332 = vmatprep.subr.bf16.mxu1 %v3813_v43  ;;  %2813 = vmatprep.subr.bf16.mxu0 %v3816_v44  ;;  %v3900_v42 = vld [vmem:[#allocation10 + $0x754] ss:$24 sps:$4 sm:$0xff]   ;;  %v4529_v43 = vpack.c.bf16 %v4496_v2, %v4496_v2  ;;  %v3895_v44 = vld [vmem:[#allocation10 + $0x5d0] ss:$24 sps:$4 sm:$0xff]  }
 0x1f2   :  { %v3909_v2 = vld [vmem:[#allocation10 + $0x574] ss:$24 sps:$4 sm:$0xff]  }
 0x1f4   :  { %1333 = vmatpush1.bf16.msra.mxu1 %v3811_v45  ;;  %2814 = vmatpush1.bf16.msra.mxu0 %v3814_v62  ;;  %v3898_v45 = vld [vmem:[#allocation10 + $0x750] ss:$24 sps:$4 sm:$0xff]   ;;  %v3903_v62 = vld [vmem:[#allocation10 + $0x5a4] ss:$24 sps:$4 sm:$0xff]  }
 0x1f5   :  { %1334 = vmatprep.subr.bf16.mxu1 %v3819_v46  ;;  %2815 = vmatprep.subr.bf16.mxu0 %v3822_v47  ;;  %v3906_v46 = vld [vmem:[#allocation10 + $0x724] ss:$24 sps:$4 sm:$0xff]   ;;  %v4533_v47 = vpack.c.bf16 %v4492_v0, %v4492_v0 }
 0x1f6   :  { %v3915_v0 = vld [vmem:[#allocation10 + $0x544] ss:$24 sps:$4 sm:$0xff]  }
 0x1f8   :  { %1335 = vmatpush1.bf16.msra.mxu1 %v3817_v48  ;;  %2816 = vmatpush1.bf16.msra.mxu0 %v3820_v49  ;;  %v3901_v48 = vld [vmem:[#allocation10 + $0x5a0] ss:$24 sps:$4 sm:$0xff]  }
 0x1f9   :  { %1336 = vmatprep.subr.bf16.mxu1 %v3825_v50  ;;  %2817 = vmatprep.subr.bf16.mxu0 %v3828_v51  ;;  %v3904_v49 = vld [vmem:[#allocation10 + $0x720] ss:$24 sps:$4 sm:$0xff]   ;;  %v3912_v50 = vld [vmem:[#allocation10 + $0x6f4] ss:$24 sps:$4 sm:$0xff]   ;;  %v3907_v51 = vld [vmem:[#allocation10 + $0x570] ss:$24 sps:$4 sm:$0xff]  }
 0x1fc   :  { %1337 = vmatpush1.bf16.msra.mxu1 %v3823_v52  ;;  %2818 = vmatpush1.bf16.msra.mxu0 %v3826_v53  ;;  %v3910_v52 = vld [vmem:[#allocation10 + $0x6f0] ss:$24 sps:$4 sm:$0xff]   ;;  %v3918_v53 = vld [vmem:[#allocation10 + $0x6c4] ss:$24 sps:$4 sm:$0xff]  }
 0x1fd   :  { %1338 = vmatprep.subr.bf16.mxu1 %v3831_v54  ;;  %2819 = vmatprep.subr.bf16.mxu0 %v3834_v55  ;;  %v3913_v54 = vld [vmem:[#allocation10 + $0x540] ss:$24 sps:$4 sm:$0xff]  }
 0x1fe   :  { %v3916_v55 = vld [vmem:[#allocation10 + $0x6c0] ss:$24 sps:$4 sm:$0xff]  }
 0x200   :  { %1339 = vmatpush1.bf16.msra.mxu1 %v3829_v56  ;;  %2820 = vmatpush1.bf16.msra.mxu0 %v3832_v57  ;;  %v3921_v56 = vld [vmem:[#allocation10 + $0x514] ss:$24 sps:$4 sm:$0xff]  }
 0x201   :  { %1340 = vmatprep.subr.bf16.mxu1 %v3837_v58  ;;  %2821 = vmatprep.subr.bf16.mxu0 %v3840_v59  ;;  %v3924_v57 = vld [vmem:[#allocation10 + $0x694] ss:$24 sps:$4 sm:$0xff]   ;;  %v3919_v58 = vld [vmem:[#allocation10 + $0x510] ss:$24 sps:$4 sm:$0xff]  }
 0x202   :  { %v3922_v59 = vld [vmem:[#allocation10 + $0x690] ss:$24 sps:$4 sm:$0xff]  }
 0x204   :  { %1341 = vmatpush1.bf16.msra.mxu1 %v3835_v60  ;;  %2822 = vmatpush1.bf16.msra.mxu0 %v3838_v61  ;;  %v3927_v60 = vld [vmem:[#allocation10 + $0x4e4] ss:$24 sps:$4 sm:$0xff]  }
 0x205   :  { %1342 = vmatprep.subr.bf16.mxu1 %v3843_v63  ;;  %2823 = vmatprep.subr.bf16.mxu0 %v3846_v1  ;;  %v3930_v61 = vld [vmem:[#allocation10 + $0x664] ss:$24 sps:$4 sm:$0xff]   ;;  %v3925_v63 = vld [vmem:[#allocation10 + $0x4e0] ss:$24 sps:$4 sm:$0xff]  }
 0x206   :  { %v3928_v1 = vld [vmem:[#allocation10 + $0x660] ss:$24 sps:$4 sm:$0xff]  }
 0x208   :  { %1343 = vmatpush1.bf16.msra.mxu1 %v3841_v3  ;;  %2824 = vmatpush1.bf16.msra.mxu0 %v3844_v5  ;;  %v3933_v3 = vld [vmem:[#allocation10 + $0x4b4] ss:$24 sps:$4 sm:$0xff]  }
 0x209   :  { %2825 = vmatprep.subr.bf16.mxu0 %v3849_v6  ;;  %2850 = vmatprep.subr.bf16.mxu1 %v3852_v8  ;;  %v3936_v5 = vld [vmem:[#allocation10 + $0x634] ss:$24 sps:$4 sm:$0xff]   ;;  %v3931_v6 = vld [vmem:[#allocation10 + $0x4b0] ss:$24 sps:$4 sm:$0xff]  }
 0x20a   :  { %v3934_v8 = vld [vmem:[#allocation10 + $0x630] ss:$24 sps:$4 sm:$0xff]  }
 0x20b   :  { %1361 = vmatmul.mubr.bf16.vlgmr.msra.gmra.mxu1 %v4512_v37  ;;  %v3894_v37 = vld [vmem:[#allocation10 + $0x304] ss:$24 sps:$4 sm:$0xff]  }
 0x20c   :  { %2826 = vmatpush2.bf16.msra.mxu0 %v3847_v9  ;;  %2851 = vmatpush1.bf16.msra.mxu1 %v3850_v10  ;;  %v3939_v9 = vld [vmem:[#allocation10 + $0x484] ss:$24 sps:$4 sm:$0xff]  }
 0x20d   :  { %2827 = vmatprep.subr.bf16.mxu0 %v3855_v11  ;;  %2852 = vmatprep.subr.bf16.mxu1 %v3858_v12  ;;  %v3942_v10 = vld [vmem:[#allocation10 + $0x604] ss:$24 sps:$4 sm:$0xff]   ;;  %v3937_v11 = vld [vmem:[#allocation10 + $0x480] ss:$24 sps:$4 sm:$0xff]  }
 0x20e   :  { %2882 = vmatprep.mubr.bf16.mxu1 %v4523_v13  ;;  %v3940_v12 = vld [vmem:[#allocation10 + $0x600] ss:$24 sps:$4 sm:$0xff]  }
 0x210   :  { %2828 = vmatpush2.bf16.msra.mxu0 %v3853_v14  ;;  %2853 = vmatpush1.bf16.msra.mxu1 %v3856_v15  ;;  %v3945_v14 = vld [vmem:[#allocation10 + $0x8d4] ss:$24 sps:$4 sm:$0xff]  }
 0x211   :  { %2829 = vmatprep.subr.bf16.mxu0 %v3861_v16  ;;  %2854 = vmatprep.subr.bf16.mxu1 %v3864_v17  ;;  %v3948_v15 = vld [vmem:[#allocation10 + $0x15c] ss:$24 sps:$4 sm:$0xff]   ;;  %v4539_v16 = vpack.c.bf16 %v4508_v33, %v4508_v33  ;;  %v3943_v17 = vld [vmem:[#allocation10 + $0x8d0] ss:$24 sps:$4 sm:$0xff]  }
 0x212   :  { %v3955_v33 = vld [vmem:[#allocation10 + $0x870] ss:$24 sps:$4 sm:$0xff]  }
 0x214   :  { %2830 = vmatpush2.bf16.msra.mxu0 %v3859_v18  ;;  %2855 = vmatpush1.bf16.msra.mxu1 %v3862_v19  ;;  %v3946_v18 = vld [vmem:[#allocation10 + $0x158] ss:$24 sps:$4 sm:$0xff]   ;;  %v3951_v19 = vld [vmem:[#allocation10 + $0x8a4] ss:$24 sps:$4 sm:$0xff]  }
 0x215   :  { %2831 = vmatprep.subr.bf16.mxu0 %v3867_v7  ;;  %2856 = vmatprep.subr.bf16.mxu1 %v3870_v20  ;;  %v3954_v7 = vld [vmem:[#allocation10 + $0x12c] ss:$24 sps:$4 sm:$0xff]   ;;  %v3949_v20 = vld [vmem:[#allocation10 + $0x8a0] ss:$24 sps:$4 sm:$0xff]  }
 0x218   :  { %2832 = vmatpush2.bf16.msra.mxu0 %v3865_v21  ;;  %2857 = vmatpush1.bf16.msra.mxu1 %v3868_v22  ;;  %v3952_v21 = vld [vmem:[#allocation10 + $0x128] ss:$24 sps:$4 sm:$0xff]   ;;  %v3957_v22 = vld [vmem:[#allocation10 + $0x874] ss:$24 sps:$4 sm:$0xff]  }
 0x219   :  { %2833 = vmatprep.subr.bf16.mxu0 %v3873_v23  ;;  %2858 = vmatprep.subr.bf16.mxu1 %v3876_v24  ;;  %v3960_v23 = vld [vmem:[#allocation10 + $0xfc] ss:$24 sps:$4 sm:$0xff]   ;;  %v3958_v24 = vld [vmem:[#allocation10 + $0xf8] ss:$24 sps:$4 sm:$0xff]  }
 0x21c   :  { %2834 = vmatpush2.bf16.msra.mxu0 %v3871_v25  ;;  %2859 = vmatpush1.bf16.msra.mxu1 %v3874_v26  ;;  %v3963_v25 = vld [vmem:[#allocation10 + $0x844] ss:$24 sps:$4 sm:$0xff]  }
 0x21d   :  { %2835 = vmatprep.subr.bf16.mxu0 %v3879_v27  ;;  %2860 = vmatprep.subr.bf16.mxu1 %v3882_v28  ;;  %v3966_v26 = vld [vmem:[#allocation10 + $0xcc] ss:$24 sps:$4 sm:$0xff]   ;;  %v3961_v27 = vld [vmem:[#allocation10 + $0x840] ss:$24 sps:$4 sm:$0xff]  }
 0x21e   :  { %v3964_v28 = vld [vmem:[#allocation10 + $0xc8] ss:$24 sps:$4 sm:$0xff]  }
 0x220   :  { %2836 = vmatpush2.bf16.msra.mxu0 %v3877_v29  ;;  %2861 = vmatpush1.bf16.msra.mxu1 %v3880_v30  ;;  %v3969_v29 = vld [vmem:[#allocation10 + $0x814] ss:$24 sps:$4 sm:$0xff]  }
 0x221   :  { %2837 = vmatprep.subr.bf16.mxu0 %v3885_v31  ;;  %2862 = vmatprep.subr.bf16.mxu1 %v3888_v32  ;;  %v3972_v30 = vld [vmem:[#allocation10 + $0x9c] ss:$24 sps:$4 sm:$0xff]   ;;  %v3967_v31 = vld [vmem:[#allocation10 + $0x810] ss:$24 sps:$4 sm:$0xff]  }
 0x222   :  { %v3970_v32 = vld [vmem:[#allocation10 + $0x98] ss:$24 sps:$4 sm:$0xff]  }
 0x224   :  { %2838 = vmatpush2.bf16.msra.mxu0 %v3883_v34  ;;  %2863 = vmatpush1.bf16.msra.mxu1 %v3886_v35  ;;  %v3975_v34 = vld [vmem:[#allocation10 + $0x7e4] ss:$24 sps:$4 sm:$0xff]  }
 0x225   :  { %2839 = vmatprep.subr.bf16.mxu0 %v3891_v36  ;;  %2864 = vmatprep.subr.bf16.mxu1 %v3894_v37  ;;  %v3978_v35 = vld [vmem:[#allocation10 + $0x6c] ss:$24 sps:$4 sm:$0xff]   ;;  %v3973_v36 = vld [vmem:[#allocation10 + $0x7e0] ss:$24 sps:$4 sm:$0xff]  }
 0x226   :  { %v3976_v37 = vld [vmem:[#allocation10 + $0x68] ss:$24 sps:$4 sm:$0xff]  }
 0x228   :  { %2840 = vmatpush2.bf16.msra.mxu0 %v3889_v38  ;;  %2865 = vmatpush1.bf16.msra.mxu1 %v3892_v39  ;;  %v3981_v38 = vld [vmem:[#allocation10 + $0x7b4] ss:$24 sps:$4 sm:$0xff]  }
 0x229   :  { %2866 = vmatprep.subr.bf16.mxu1 %v3897_v41  ;;  %2891 = vmatprep.subr.bf16.mxu0 %v3900_v42  ;;  %v3984_v39 = vld [vmem:[#allocation10 + $0x3c] ss:$24 sps:$4 sm:$0xff]   ;;  %v3979_v41 = vld [vmem:[#allocation10 + $0x7b0] ss:$24 sps:$4 sm:$0xff]  }
 0x22a   :  { %v3982_v42 = vld [vmem:[#allocation10 + $0x38] ss:$24 sps:$4 sm:$0xff]  }
 0x22b   :  { %2842 = vmatmul.mubr.bf16.vlgmr.msra.gmra.mxu0 %v4529_v43 }
 0x22c   :  { %2867 = vmatpush2.bf16.msra.mxu1 %v3895_v44  ;;  %2892 = vmatpush1.bf16.msra.mxu0 %v3898_v45  ;;  %v3987_v44 = vld [vmem:[#allocation10 + $0x784] ss:$24 sps:$4 sm:$0xff]  }
 0x22d   :  { %2868 = vmatprep.subr.bf16.mxu1 %v3903_v62  ;;  %2893 = vmatprep.subr.bf16.mxu0 %v3906_v46  ;;  %v3990_v45 = vld [vmem:[#allocation10 + $0xc] ss:$24 sps:$4 sm:$0xff]   ;;  %v3985_v62 = vld [vmem:[#allocation10 + $0x780] ss:$24 sps:$4 sm:$0xff]  }
 0x22e   :  { %2923 = vmatprep.mubr.bf16.mxu0 %v4533_v47  ;;  %v3988_v46 = vld [vmem:[#allocation10 + $0x8] ss:$24 sps:$4 sm:$0xff]  }
 0x230   :  { %2869 = vmatpush2.bf16.msra.mxu1 %v3901_v48  ;;  %2894 = vmatpush1.bf16.msra.mxu0 %v3904_v49  ;;  %v3993_v48 = vld [vmem:[#allocation10 + $0x2dc] ss:$24 sps:$4 sm:$0xff]  }
 0x231   :  { %2870 = vmatprep.subr.bf16.mxu1 %v3909_v2  ;;  %2895 = vmatprep.subr.bf16.mxu0 %v3912_v50  ;;  %v3996_v49 = vld [vmem:[#allocation10 + $0x45c] ss:$24 sps:$4 sm:$0xff]   ;;  %v4545_v2 = vpack.c.bf16 %v4500_v4, %v4500_v4  ;;  %v3991_v50 = vld [vmem:[#allocation10 + $0x2d8] ss:$24 sps:$4 sm:$0xff]  }
 0x232   :  { %v4003_v4 = vld [vmem:[#allocation10 + $0x278] ss:$24 sps:$4 sm:$0xff]  }
 0x234   :  { %2871 = vmatpush2.bf16.msra.mxu1 %v3907_v51  ;;  %2896 = vmatpush1.bf16.msra.mxu0 %v3910_v52  ;;  %v3994_v51 = vld [vmem:[#allocation10 + $0x458] ss:$24 sps:$4 sm:$0xff]   ;;  %v3999_v52 = vld [vmem:[#allocation10 + $0x2ac] ss:$24 sps:$4 sm:$0xff]  }
 0x235   :  { %2872 = vmatprep.subr.bf16.mxu1 %v3915_v0  ;;  %2897 = vmatprep.subr.bf16.mxu0 %v3918_v53  ;;  %v4002_v0 = vld [vmem:[#allocation10 + $0x42c] ss:$24 sps:$4 sm:$0xff]   ;;  %v3997_v53 = vld [vmem:[#allocation10 + $0x2a8] ss:$24 sps:$4 sm:$0xff]  }
 0x238   :  { %2873 = vmatpush2.bf16.msra.mxu1 %v3913_v54  ;;  %2898 = vmatpush1.bf16.msra.mxu0 %v3916_v55  ;;  %v4000_v54 = vld [vmem:[#allocation10 + $0x428] ss:$24 sps:$4 sm:$0xff]   ;;  %v4005_v55 = vld [vmem:[#allocation10 + $0x27c] ss:$24 sps:$4 sm:$0xff]  }
 0x239   :  { %2874 = vmatprep.subr.bf16.mxu1 %v3921_v56  ;;  %2899 = vmatprep.subr.bf16.mxu0 %v3924_v57  ;;  %v4008_v56 = vld [vmem:[#allocation10 + $0x3fc] ss:$24 sps:$4 sm:$0xff]   ;;  %v4006_v57 = vld [vmem:[#allocation10 + $0x3f8] ss:$24 sps:$4 sm:$0xff]  }
 0x23c   :  { %2875 = vmatpush2.bf16.msra.mxu1 %v3919_v58  ;;  %2900 = vmatpush1.bf16.msra.mxu0 %v3922_v59  ;;  %v4011_v58 = vld [vmem:[#allocation10 + $0x24c] ss:$24 sps:$4 sm:$0xff]  }
 0x23d   :  { %2876 = vmatprep.subr.bf16.mxu1 %v3927_v60  ;;  %2901 = vmatprep.subr.bf16.mxu0 %v3930_v61  ;;  %v4014_v59 = vld [vmem:[#allocation10 + $0x3cc] ss:$24 sps:$4 sm:$0xff]   ;;  %v4009_v60 = vld [vmem:[#allocation10 + $0x248] ss:$24 sps:$4 sm:$0xff]  }
 0x23e   :  { %v4012_v61 = vld [vmem:[#allocation10 + $0x3c8] ss:$24 sps:$4 sm:$0xff]  }
 0x240   :  { %2877 = vmatpush2.bf16.msra.mxu1 %v3925_v63  ;;  %2902 = vmatpush1.bf16.msra.mxu0 %v3928_v1  ;;  %v4017_v63 = vld [vmem:[#allocation10 + $0x21c] ss:$24 sps:$4 sm:$0xff]  }
 0x241   :  { %2878 = vmatprep.subr.bf16.mxu1 %v3933_v3  ;;  %2903 = vmatprep.subr.bf16.mxu0 %v3936_v5  ;;  %v4020_v1 = vld [vmem:[#allocation10 + $0x39c] ss:$24 sps:$4 sm:$0xff]   ;;  %v4015_v3 = vld [vmem:[#allocation10 + $0x218] ss:$24 sps:$4 sm:$0xff]  }
 0x242   :  { %v4018_v5 = vld [vmem:[#allocation10 + $0x398] ss:$24 sps:$4 sm:$0xff]  }
 0x244   :  { %2879 = vmatpush2.bf16.msra.mxu1 %v3931_v6  ;;  %2904 = vmatpush1.bf16.msra.mxu0 %v3934_v8  ;;  %v4023_v6 = vld [vmem:[#allocation10 + $0x1ec] ss:$24 sps:$4 sm:$0xff]  }
 0x245   :  { %2880 = vmatprep.subr.bf16.mxu1 %v3939_v9  ;;  %2905 = vmatprep.subr.bf16.mxu0 %v3942_v10  ;;  %v4026_v8 = vld [vmem:[#allocation10 + $0x36c] ss:$24 sps:$4 sm:$0xff]   ;;  %v4021_v9 = vld [vmem:[#allocation10 + $0x1e8] ss:$24 sps:$4 sm:$0xff]  }
 0x246   :  { %v4024_v10 = vld [vmem:[#allocation10 + $0x368] ss:$24 sps:$4 sm:$0xff]  }
 0x248   :  { %2881 = vmatpush2.bf16.msra.mxu1 %v3937_v11  ;;  %2906 = vmatpush1.bf16.msra.mxu0 %v3940_v12  ;;  %v4029_v11 = vld [vmem:[#allocation10 + $0x1bc] ss:$24 sps:$4 sm:$0xff]  }
 0x249   :  { %2907 = vmatprep.subr.bf16.mxu0 %v3945_v14  ;;  %2932 = vmatprep.subr.bf16.mxu1 %v3948_v15  ;;  %v4032_v12 = vld [vmem:[#allocation10 + $0x33c] ss:$24 sps:$4 sm:$0xff]   ;;  %v4027_v14 = vld [vmem:[#allocation10 + $0x1b8] ss:$24 sps:$4 sm:$0xff]  }
 0x24a   :  { %v4030_v15 = vld [vmem:[#allocation10 + $0x338] ss:$24 sps:$4 sm:$0xff]  }
 0x24b   :  { %2883 = vmatmul.mubr.bf16.vlgmr.msra.gmra.mxu1 %v4539_v16 }
 0x24c   :  { %2908 = vmatpush2.bf16.msra.mxu0 %v3943_v17  ;;  %2933 = vmatpush1.bf16.msra.mxu1 %v3946_v18  ;;  %v4035_v17 = vld [vmem:[#allocation10 + $0x18c] ss:$24 sps:$4 sm:$0xff]  }
 0x24d   :  { %2909 = vmatprep.subr.bf16.mxu0 %v3951_v19  ;;  %2934 = vmatprep.subr.bf16.mxu1 %v3954_v7  ;;  %v4038_v18 = vld [vmem:[#allocation10 + $0x30c] ss:$24 sps:$4 sm:$0xff]   ;;  %v4033_v19 = vld [vmem:[#allocation10 + $0x188] ss:$24 sps:$4 sm:$0xff]  }
 0x24e   :  { %2964 = vmatprep.mubr.bf16.mxu1 %v4516_v40  ;;  %v4036_v7 = vld [vmem:[#allocation10 + $0x308] ss:$24 sps:$4 sm:$0xff]  }
 0x250   :  { %2910 = vmatpush2.bf16.msra.mxu0 %v3949_v20  ;;  %2935 = vmatpush1.bf16.msra.mxu1 %v3952_v21  ;;  %v4041_v20 = vld [vmem:[#allocation10 + $0x5dc] ss:$24 sps:$4 sm:$0xff]  }
 0x251   :  { %2911 = vmatprep.subr.bf16.mxu0 %v3957_v22  ;;  %2936 = vmatprep.subr.bf16.mxu1 %v3960_v23  ;;  %v4044_v21 = vld [vmem:[#allocation10 + $0x75c] ss:$24 sps:$4 sm:$0xff]   ;;  %v4039_v22 = vld [vmem:[#allocation10 + $0x5d8] ss:$24 sps:$4 sm:$0xff]  }
 0x252   :  { %v4042_v23 = vld [vmem:[#allocation10 + $0x758] ss:$24 sps:$4 sm:$0xff]  }
 0x254   :  { %2912 = vmatpush2.bf16.msra.mxu0 %v3955_v33  ;;  %2937 = vmatpush1.bf16.msra.mxu1 %v3958_v24  ;;  %v4047_v33 = vld [vmem:[#allocation10 + $0x5ac] ss:$24 sps:$4 sm:$0xff]  }
 0x255   :  { %2913 = vmatprep.subr.bf16.mxu0 %v3963_v25  ;;  %2938 = vmatprep.subr.bf16.mxu1 %v3966_v26  ;;  %v4050_v24 = vld [vmem:[#allocation10 + $0x72c] ss:$24 sps:$4 sm:$0xff]   ;;  %v4045_v25 = vld [vmem:[#allocation10 + $0x5a8] ss:$24 sps:$4 sm:$0xff]  }
 0x256   :  { %v4048_v26 = vld [vmem:[#allocation10 + $0x728] ss:$24 sps:$4 sm:$0xff]  }
 0x258   :  { %2914 = vmatpush2.bf16.msra.mxu0 %v3961_v27  ;;  %2939 = vmatpush1.bf16.msra.mxu1 %v3964_v28  ;;  %v4053_v27 = vld [vmem:[#allocation10 + $0x57c] ss:$24 sps:$4 sm:$0xff]  }
 0x259   :  { %2915 = vmatprep.subr.bf16.mxu0 %v3969_v29  ;;  %2940 = vmatprep.subr.bf16.mxu1 %v3972_v30  ;;  %v4056_v28 = vld [vmem:[#allocation10 + $0x6fc] ss:$24 sps:$4 sm:$0xff]   ;;  %v4051_v29 = vld [vmem:[#allocation10 + $0x578] ss:$24 sps:$4 sm:$0xff]  }
 0x25a   :  { %v4054_v30 = vld [vmem:[#allocation10 + $0x6f8] ss:$24 sps:$4 sm:$0xff]  }
 0x25c   :  { %2916 = vmatpush2.bf16.msra.mxu0 %v3967_v31  ;;  %2941 = vmatpush1.bf16.msra.mxu1 %v3970_v32  ;;  %v4059_v31 = vld [vmem:[#allocation10 + $0x54c] ss:$24 sps:$4 sm:$0xff]  }
 0x25d   :  { %2917 = vmatprep.subr.bf16.mxu0 %v3975_v34  ;;  %2942 = vmatprep.subr.bf16.mxu1 %v3978_v35  ;;  %v4062_v32 = vld [vmem:[#allocation10 + $0x6cc] ss:$24 sps:$4 sm:$0xff]   ;;  %v4057_v34 = vld [vmem:[#allocation10 + $0x548] ss:$24 sps:$4 sm:$0xff]  }
 0x25e   :  { %v4060_v35 = vld [vmem:[#allocation10 + $0x6c8] ss:$24 sps:$4 sm:$0xff]  }
 0x260   :  { %2918 = vmatpush2.bf16.msra.mxu0 %v3973_v36  ;;  %2943 = vmatpush1.bf16.msra.mxu1 %v3976_v37  ;;  %v4065_v36 = vld [vmem:[#allocation10 + $0x51c] ss:$24 sps:$4 sm:$0xff]  }
 0x261   :  { %2919 = vmatprep.subr.bf16.mxu0 %v3981_v38  ;;  %2944 = vmatprep.subr.bf16.mxu1 %v3984_v39  ;;  %v4068_v37 = vld [vmem:[#allocation10 + $0x69c] ss:$24 sps:$4 sm:$0xff]   ;;  %v4063_v38 = vld [vmem:[#allocation10 + $0x518] ss:$24 sps:$4 sm:$0xff]  }
 0x262   :  { %v4066_v39 = vld [vmem:[#allocation10 + $0x698] ss:$24 sps:$4 sm:$0xff]  }
 0x264   :  { %2920 = vmatpush2.bf16.msra.mxu0 %v3979_v41  ;;  %2945 = vmatpush1.bf16.msra.mxu1 %v3982_v42  ;;  %v4071_v41 = vld [vmem:[#allocation10 + $0x4ec] ss:$24 sps:$4 sm:$0xff]  }
 0x265   :  { %2921 = vmatprep.subr.bf16.mxu0 %v3987_v44  ;;  %2946 = vmatprep.subr.bf16.mxu1 %v3990_v45  ;;  %v4074_v42 = vld [vmem:[#allocation10 + $0x66c] ss:$24 sps:$4 sm:$0xff]   ;;  %v4069_v44 = vld [vmem:[#allocation10 + $0x4e8] ss:$24 sps:$4 sm:$0xff]  }
 0x266   :  { %v4072_v45 = vld [vmem:[#allocation10 + $0x668] ss:$24 sps:$4 sm:$0xff]  }
 0x268   :  { %2922 = vmatpush2.bf16.msra.mxu0 %v3985_v62  ;;  %2947 = vmatpush1.bf16.msra.mxu1 %v3988_v46  ;;  %v4077_v62 = vld [vmem:[#allocation10 + $0x4bc] ss:$24 sps:$4 sm:$0xff]  }
 0x269   :  { %2948 = vmatprep.subr.bf16.mxu1 %v3993_v48  ;;  %2973 = vmatprep.subr.bf16.mxu0 %v3996_v49  ;;  %v4080_v46 = vld [vmem:[#allocation10 + $0x63c] ss:$24 sps:$4 sm:$0xff]   ;;  %v4075_v48 = vld [vmem:[#allocation10 + $0x4b8] ss:$24 sps:$4 sm:$0xff]  }
 0x26a   :  { %v4078_v49 = vld [vmem:[#allocation10 + $0x638] ss:$24 sps:$4 sm:$0xff]  }
 0x26b   :  { %2924 = vmatmul.mubr.bf16.vlgmr.msra.gmra.mxu0 %v4545_v2 }
 0x26c   :  { %2949 = vmatpush2.bf16.msra.mxu1 %v3991_v50  ;;  %2974 = vmatpush1.bf16.msra.mxu0 %v3994_v51  ;;  %v4083_v50 = vld [vmem:[#allocation10 + $0x48c] ss:$24 sps:$4 sm:$0xff]  }
 0x26d   :  { %2950 = vmatprep.subr.bf16.mxu1 %v3999_v52  ;;  %2975 = vmatprep.subr.bf16.mxu0 %v4002_v0  ;;  %v4086_v51 = vld [vmem:[#allocation10 + $0x60c] ss:$24 sps:$4 sm:$0xff]   ;;  %v4081_v52 = vld [vmem:[#allocation10 + $0x488] ss:$24 sps:$4 sm:$0xff]  }
 0x26e   :  { %3005 = vmatprep.mubr.bf16.mxu0 %v4523_v13  ;;  %v4084_v0 = vld [vmem:[#allocation10 + $0x608] ss:$24 sps:$4 sm:$0xff]  }
 0x270   :  { %2951 = vmatpush2.bf16.msra.mxu1 %v3997_v53  ;;  %2976 = vmatpush1.bf16.msra.mxu0 %v4000_v54  ;;  %v4089_v53 = vld [vmem:[#allocation10 + $0x8dc] ss:$24 sps:$4 sm:$0xff]  }
 0x271   :  { %2952 = vmatprep.subr.bf16.mxu1 %v4005_v55  ;;  %2977 = vmatprep.subr.bf16.mxu0 %v4008_v56  ;;  %v4092_v54 = vld [vmem:[#allocation10 + $0x164] ss:$24 sps:$4 sm:$0xff]   ;;  %v4087_v55 = vld [vmem:[#allocation10 + $0x8d8] ss:$24 sps:$4 sm:$0xff]  }
 0x272   :  { %v4090_v56 = vld [vmem:[#allocation10 + $0x160] ss:$24 sps:$4 sm:$0xff]  }
 0x274   :  { %2953 = vmatpush2.bf16.msra.mxu1 %v4003_v4  ;;  %2978 = vmatpush1.bf16.msra.mxu0 %v4006_v57  ;;  %v4095_v4 = vld [vmem:[#allocation10 + $0x8ac] ss:$24 sps:$4 sm:$0xff]  }
 0x275   :  { %2954 = vmatprep.subr.bf16.mxu1 %v4011_v58  ;;  %2979 = vmatprep.subr.bf16.mxu0 %v4014_v59  ;;  %v4098_v57 = vld [vmem:[#allocation10 + $0x134] ss:$24 sps:$4 sm:$0xff]  }
 0x278   :  { %2955 = vmatpush2.bf16.msra.mxu1 %v4009_v60  ;;  %2980 = vmatpush1.bf16.msra.mxu0 %v4012_v61  ;;  %v4093_v60 = vld [vmem:[#allocation10 + $0x8a8] ss:$24 sps:$4 sm:$0xff]  }
 0x279   :  { %2956 = vmatprep.subr.bf16.mxu1 %v4017_v63  ;;  %2981 = vmatprep.subr.bf16.mxu0 %v4020_v1  ;;  %v4096_v61 = vld [vmem:[#allocation10 + $0x130] ss:$24 sps:$4 sm:$0xff]  }
 0x27c   :  { %2957 = vmatpush2.bf16.msra.mxu1 %v4015_v3  ;;  %2982 = vmatpush1.bf16.msra.mxu0 %v4018_v5  ;;  %v4101_v3 = vld [vmem:[#allocation10 + $0x87c] ss:$24 sps:$4 sm:$0xff]  }
 0x27d   :  { %2958 = vmatprep.subr.bf16.mxu1 %v4023_v6  ;;  %2983 = vmatprep.subr.bf16.mxu0 %v4026_v8  ;;  %v4104_v5 = vld [vmem:[#allocation10 + $0x104] ss:$24 sps:$4 sm:$0xff]  }
 0x280   :  { %2959 = vmatpush2.bf16.msra.mxu1 %v4021_v9  ;;  %2984 = vmatpush1.bf16.msra.mxu0 %v4024_v10  ;;  %v4099_v9 = vld [vmem:[#allocation10 + $0x878] ss:$24 sps:$4 sm:$0xff]  }
 0x281   :  { %2960 = vmatprep.subr.bf16.mxu1 %v4029_v11  ;;  %2985 = vmatprep.subr.bf16.mxu0 %v4032_v12  ;;  %v4102_v10 = vld [vmem:[#allocation10 + $0x100] ss:$24 sps:$4 sm:$0xff]  }
 0x284   :  { %2961 = vmatpush2.bf16.msra.mxu1 %v4027_v14  ;;  %2986 = vmatpush1.bf16.msra.mxu0 %v4030_v15  ;;  %v4107_v14 = vld [vmem:[#allocation10 + $0x84c] ss:$24 sps:$4 sm:$0xff]  }
 0x285   :  { %2962 = vmatprep.subr.bf16.mxu1 %v4035_v17  ;;  %2987 = vmatprep.subr.bf16.mxu0 %v4038_v18  ;;  %v4110_v15 = vld [vmem:[#allocation10 + $0xd4] ss:$24 sps:$4 sm:$0xff]   ;;  %v4105_v17 = vld [vmem:[#allocation10 + $0x848] ss:$24 sps:$4 sm:$0xff]  }
 0x286   :  { %v4108_v18 = vld [vmem:[#allocation10 + $0xd0] ss:$24 sps:$4 sm:$0xff]  }
 0x288   :  { %2963 = vmatpush2.bf16.msra.mxu1 %v4033_v19  ;;  %2988 = vmatpush1.bf16.msra.mxu0 %v4036_v7  ;;  %v4113_v19 = vld [vmem:[#allocation10 + $0x81c] ss:$24 sps:$4 sm:$0xff]   ;;  %v4111_v7 = vld [vmem:[#allocation10 + $0x818] ss:$24 sps:$4 sm:$0xff]  }
 0x289   :  { %2989 = vmatprep.subr.bf16.mxu0 %v4041_v20  ;;  %3014 = vmatprep.subr.bf16.mxu1 %v4044_v21  ;;  %v4114_v20 = vld [vmem:[#allocation10 + $0xa0] ss:$24 sps:$4 sm:$0xff]   ;;  %v4119_v21 = vld [vmem:[#allocation10 + $0x7ec] ss:$24 sps:$4 sm:$0xff]  }
 0x28b   :  { %2965 = vmatmul.mubr.bf16.vlgmr.msra.gmra.mxu1 %v4529_v43 }
 0x28c   :  { %2990 = vmatpush2.bf16.msra.mxu0 %v4039_v22  ;;  %3015 = vmatpush1.bf16.msra.mxu1 %v4042_v23  ;;  %v4122_v22 = vld [vmem:[#allocation10 + $0x74] ss:$24 sps:$4 sm:$0xff]   ;;  %v4117_v23 = vld [vmem:[#allocation10 + $0x7e8] ss:$24 sps:$4 sm:$0xff]  }
 0x28d   :  { %2991 = vmatprep.subr.bf16.mxu0 %v4047_v33  ;;  %3016 = vmatprep.subr.bf16.mxu1 %v4050_v24  ;;  %v4120_v33 = vld [vmem:[#allocation10 + $0x70] ss:$24 sps:$4 sm:$0xff]   ;;  %v4125_v24 = vld [vmem:[#allocation10 + $0x7bc] ss:$24 sps:$4 sm:$0xff]  }
 0x28e   :  { %3046 = vmatprep.mubr.bf16.mxu1 %v4533_v47 }
 0x290   :  { %2992 = vmatpush2.bf16.msra.mxu0 %v4045_v25  ;;  %3017 = vmatpush1.bf16.msra.mxu1 %v4048_v26  ;;  %v4128_v25 = vld [vmem:[#allocation10 + $0x44] ss:$24 sps:$4 sm:$0xff]   ;;  %v4123_v26 = vld [vmem:[#allocation10 + $0x7b8] ss:$24 sps:$4 sm:$0xff]  }
 0x291   :  { %2993 = vmatprep.subr.bf16.mxu0 %v4053_v27  ;;  %3018 = vmatprep.subr.bf16.mxu1 %v4056_v28  ;;  %v4126_v27 = vld [vmem:[#allocation10 + $0x40] ss:$24 sps:$4 sm:$0xff]   ;;  %v4131_v28 = vld [vmem:[#allocation10 + $0x78c] ss:$24 sps:$4 sm:$0xff]  }
 0x294   :  { %2994 = vmatpush2.bf16.msra.mxu0 %v4051_v29  ;;  %3019 = vmatpush1.bf16.msra.mxu1 %v4054_v30  ;;  %v4134_v29 = vld [vmem:[#allocation10 + $0x14] ss:$24 sps:$4 sm:$0xff]   ;;  %v4129_v30 = vld [vmem:[#allocation10 + $0x788] ss:$24 sps:$4 sm:$0xff]  }
 0x295   :  { %2995 = vmatprep.subr.bf16.mxu0 %v4059_v31  ;;  %3020 = vmatprep.subr.bf16.mxu1 %v4062_v32  ;;  %v4132_v31 = vld [vmem:[#allocation10 + $0x10] ss:$24 sps:$4 sm:$0xff]   ;;  %v4137_v32 = vld [vmem:[#allocation10 + $0x2e4] ss:$24 sps:$4 sm:$0xff]  }
 0x298   :  { %2996 = vmatpush2.bf16.msra.mxu0 %v4057_v34  ;;  %3021 = vmatpush1.bf16.msra.mxu1 %v4060_v35  ;;  %v4140_v34 = vld [vmem:[#allocation10 + $0x464] ss:$24 sps:$4 sm:$0xff]   ;;  %v4135_v35 = vld [vmem:[#allocation10 + $0x2e0] ss:$24 sps:$4 sm:$0xff]  }
 0x299   :  { %2997 = vmatprep.subr.bf16.mxu0 %v4065_v36  ;;  %3022 = vmatprep.subr.bf16.mxu1 %v4068_v37  ;;  %v4138_v36 = vld [vmem:[#allocation10 + $0x460] ss:$24 sps:$4 sm:$0xff]   ;;  %v4143_v37 = vld [vmem:[#allocation10 + $0x2b4] ss:$24 sps:$4 sm:$0xff]  }
 0x29c   :  { %2998 = vmatpush2.bf16.msra.mxu0 %v4063_v38  ;;  %3023 = vmatpush1.bf16.msra.mxu1 %v4066_v39  ;;  %v4146_v38 = vld [vmem:[#allocation10 + $0x434] ss:$24 sps:$4 sm:$0xff]  }
 0x29d   :  { %2999 = vmatprep.subr.bf16.mxu0 %v4071_v41  ;;  %3024 = vmatprep.subr.bf16.mxu1 %v4074_v42  ;;  %v4141_v41 = vld [vmem:[#allocation10 + $0x2b0] ss:$24 sps:$4 sm:$0xff]  }
 0x29e   :  { %v4144_v42 = vld [vmem:[#allocation10 + $0x430] ss:$24 sps:$4 sm:$0xff]  }
 0x2a0   :  { %3000 = vmatpush2.bf16.msra.mxu0 %v4069_v44  ;;  %3025 = vmatpush1.bf16.msra.mxu1 %v4072_v45  ;;  %v4149_v45 = vld [vmem:[#allocation10 + $0x284] ss:$24 sps:$4 sm:$0xff]  }
 0x2a1   :  { %3001 = vmatprep.subr.bf16.mxu0 %v4077_v62  ;;  %3026 = vmatprep.subr.bf16.mxu1 %v4080_v46  ;;  %v4152_v62 = vld [vmem:[#allocation10 + $0x404] ss:$24 sps:$4 sm:$0xff]  }
 0x2a4   :  { %3002 = vmatpush2.bf16.msra.mxu0 %v4075_v48  ;;  %3027 = vmatpush1.bf16.msra.mxu1 %v4078_v49  ;;  %v4147_v48 = vld [vmem:[#allocation10 + $0x280] ss:$24 sps:$4 sm:$0xff]  }
 0x2a5   :  { %3003 = vmatprep.subr.bf16.mxu0 %v4083_v50  ;;  %3028 = vmatprep.subr.bf16.mxu1 %v4086_v51  ;;  %v4150_v49 = vld [vmem:[#allocation10 + $0x400] ss:$24 sps:$4 sm:$0xff]   ;;  %v4155_v51 = vld [vmem:[#allocation10 + $0x254] ss:$24 sps:$4 sm:$0xff]  }
 0x2a8   :  { %3004 = vmatpush2.bf16.msra.mxu0 %v4081_v52  ;;  %3029 = vmatpush1.bf16.msra.mxu1 %v4084_v0  ;;  %v4158_v52 = vld [vmem:[#allocation10 + $0x3d4] ss:$24 sps:$4 sm:$0xff]   ;;  %v4153_v0 = vld [vmem:[#allocation10 + $0x250] ss:$24 sps:$4 sm:$0xff]  }
 0x2a9   :  { %3030 = vmatprep.subr.bf16.mxu1 %v4089_v53  ;;  %3055 = vmatprep.subr.bf16.mxu0 %v4092_v54  ;;  %v4156_v53 = vld [vmem:[#allocation10 + $0x3d0] ss:$24 sps:$4 sm:$0xff]   ;;  %v4161_v54 = vld [vmem:[#allocation10 + $0x224] ss:$24 sps:$4 sm:$0xff]  }
 0x2ab   :  { %3006 = vmatmul.mubr.bf16.vlgmr.msra.gmra.mxu0 %v4539_v16  ;;  %v4552_v58 = vpop.f32.mrf.mxu1  ;;  %v4554_v59 = vpop.f32.mrf.mxu0 }
 0x2ac   :  { %3031 = vmatpush2.bf16.msra.mxu1 %v4087_v55  ;;  %3056 = vmatpush1.bf16.msra.mxu0 %v4090_v56  ;;  %v4164_v55 = vld [vmem:[#allocation10 + $0x3a4] ss:$24 sps:$4 sm:$0xff]   ;;  %v4162_v56 = vld [vmem:[#allocation10 + $0x3a0] ss:$24 sps:$4 sm:$0xff]  }
 0x2ad   :  { %v4556_v63 = vpop.f32.mrf.mxu1  ;;  %v4558_v1 = vpop.f32.mrf.mxu0  ;;  %3032 = vmatprep.subr.bf16.mxu1 %v4095_v4  ;;  %3057 = vmatprep.subr.bf16.mxu0 %v4098_v57  ;;  %v4167_v4 = vld [vmem:[#allocation10 + $0x1f4] ss:$24 sps:$4 sm:$0xff]  }
 0x2ae   :  { %3087 = vmatprep.mubr.bf16.mxu0 %v4516_v40  ;;  %v4116_v40 = vld [vmem:[#allocation10 + $0xa4] ss:$24 sps:$4 sm:$0xff]   ;;  %v4170_v57 = vld [vmem:[#allocation10 + $0x374] ss:$24 sps:$4 sm:$0xff]  }
 0x2af   :  { %v1284_v6 = vpop.f32.mrf.mxu1  ;;  %v1325_v8 = vpop.f32.mrf.mxu0 }
 0x2b0   :  { %3033 = vmatpush2.bf16.msra.mxu1 %v4093_v60  ;;  %3058 = vmatpush1.bf16.msra.mxu0 %v4096_v61  ;;  %v4165_v60 = vld [vmem:[#allocation10 + $0x1f0] ss:$24 sps:$4 sm:$0xff]   ;;  %v4171_v6 = vld [vmem:[#allocation10 + $0x1c0] ss:$24 sps:$4 sm:$0xff]  }
 0x2b1   :  { %v1285_v11 = vpop.f32.mrf.mxu1  ;;  %v1326_v12 = vpop.f32.mrf.mxu0  ;;  %3034 = vmatprep.subr.bf16.mxu1 %v4101_v3  ;;  %3059 = vmatprep.subr.bf16.mxu0 %v4104_v5  ;;  %v4168_v61 = vld [vmem:[#allocation10 + $0x370] ss:$24 sps:$4 sm:$0xff]   ;;  %v4173_v3 = vld [vmem:[#allocation10 + $0x1c4] ss:$24 sps:$4 sm:$0xff]   ;;  %v4174_v8 = vld [vmem:[#allocation10 + $0x340] ss:$24 sps:$4 sm:$0xff]  }
 0x2b2   :  { %v4176_v5 = vld [vmem:[#allocation10 + $0x344] ss:$24 sps:$4 sm:$0xff]   ;;  %v4177_v11 = vld [vmem:[#allocation10 + $0x190] ss:$24 sps:$4 sm:$0xff]  }
 0x2b3   :  { %v4180_v12 = vld [vmem:[#allocation10 + $0x310] ss:$24 sps:$4 sm:$0xff]  }
 0x2b4   :  { %3035 = vmatpush2.bf16.msra.mxu1 %v4099_v9  ;;  %3060 = vmatpush1.bf16.msra.mxu0 %v4102_v10  ;;  %v4179_v9 = vld [vmem:[#allocation10 + $0x194] ss:$24 sps:$4 sm:$0xff]  }
 0x2b5   :  { %3036 = vmatprep.subr.bf16.mxu1 %v4107_v14  ;;  %3061 = vmatprep.subr.bf16.mxu0 %v4110_v15  ;;  %v4182_v10 = vld [vmem:[#allocation10 + $0x314] ss:$24 sps:$4 sm:$0xff]   ;;  %v4185_v14 = vld [vmem:[#allocation10 + $0x5e4] ss:$24 sps:$4 sm:$0xff]  }
 0x2b6   :  { %v4188_v15 = vld [vmem:[#allocation10 + $0x764] ss:$24 sps:$4 sm:$0xff]  }
 0x2b8   :  { %3037 = vmatpush2.bf16.msra.mxu1 %v4105_v17  ;;  %3062 = vmatpush1.bf16.msra.mxu0 %v4108_v18  ;;  %v4183_v17 = vld [vmem:[#allocation10 + $0x5e0] ss:$24 sps:$4 sm:$0xff]  }
 0x2b9   :  { %3038 = vmatprep.subr.bf16.mxu1 %v4113_v19  ;;  %3063 = vmatprep.subr.bf16.mxu0 %v4116_v40  ;;  %v4186_v18 = vld [vmem:[#allocation10 + $0x760] ss:$24 sps:$4 sm:$0xff]   ;;  %v4191_v19 = vld [vmem:[#allocation10 + $0x5b4] ss:$24 sps:$4 sm:$0xff]  }
 0x2ba   :  { %v4194_v40 = vld [vmem:[#allocation10 + $0x734] ss:$24 sps:$4 sm:$0xff]  }
 0x2bc   :  { %3039 = vmatpush2.bf16.msra.mxu1 %v4111_v7  ;;  %3064 = vmatpush1.bf16.msra.mxu0 %v4114_v20  ;;  %v4189_v20 = vld [vmem:[#allocation10 + $0x5b0] ss:$24 sps:$4 sm:$0xff]  }
 0x2bd   :  { %3040 = vmatprep.subr.bf16.mxu1 %v4119_v21  ;;  %3065 = vmatprep.subr.bf16.mxu0 %v4122_v22  ;;  %v4192_v21 = vld [vmem:[#allocation10 + $0x730] ss:$24 sps:$4 sm:$0xff]  }
 0x2c0   :  { %3041 = vmatpush2.bf16.msra.mxu1 %v4117_v23  ;;  %3066 = vmatpush1.bf16.msra.mxu0 %v4120_v33  ;;  %v4197_v23 = vld [vmem:[#allocation10 + $0x584] ss:$24 sps:$4 sm:$0xff]  }
 0x2c1   :  { %3042 = vmatprep.subr.bf16.mxu1 %v4125_v24  ;;  %3067 = vmatprep.subr.bf16.mxu0 %v4128_v25  ;;  %v4200_v33 = vld [vmem:[#allocation10 + $0x704] ss:$24 sps:$4 sm:$0xff]   ;;  %v4195_v25 = vld [vmem:[#allocation10 + $0x580] ss:$24 sps:$4 sm:$0xff]  }
 0x2c4   :  { %3043 = vmatpush2.bf16.msra.mxu1 %v4123_v26  ;;  %3068 = vmatpush1.bf16.msra.mxu0 %v4126_v27  ;;  %v4198_v26 = vld [vmem:[#allocation10 + $0x700] ss:$24 sps:$4 sm:$0xff]  }
 0x2c5   :  { %3044 = vmatprep.subr.bf16.mxu1 %v4131_v28  ;;  %3069 = vmatprep.subr.bf16.mxu0 %v4134_v29  ;;  %v4206_v28 = vld [vmem:[#allocation10 + $0x6d4] ss:$24 sps:$4 sm:$0xff]   ;;  %v4201_v29 = vld [vmem:[#allocation10 + $0x550] ss:$24 sps:$4 sm:$0xff]  }
 0x2c8   :  { %3045 = vmatpush2.bf16.msra.mxu1 %v4129_v30  ;;  %3070 = vmatpush1.bf16.msra.mxu0 %v4132_v31  ;;  %v4204_v30 = vld [vmem:[#allocation10 + $0x6d0] ss:$24 sps:$4 sm:$0xff]   ;;  %v4209_v31 = vld [vmem:[#allocation10 + $0x524] ss:$24 sps:$4 sm:$0xff]  }
 0x2c9   :  { %3071 = vmatprep.subr.bf16.mxu0 %v4137_v32  ;;  %3096 = vmatprep.subr.bf16.mxu1 %v4140_v34  ;;  %v4212_v32 = vld [vmem:[#allocation10 + $0x6a4] ss:$24 sps:$4 sm:$0xff]   ;;  %v4210_v34 = vld [vmem:[#allocation10 + $0x6a0] ss:$24 sps:$4 sm:$0xff]  }
 0x2cb   :  { %v4561_v39 = vpop.f32.mrf.mxu1  ;;  %3047 = vmatmul.mubr.bf16.vlgmr.msra.gmra.mxu1 %v4545_v2 }
 0x2cc   :  { %3072 = vmatpush2.bf16.msra.mxu0 %v4135_v35  ;;  %3097 = vmatpush1.bf16.msra.mxu1 %v4138_v36  ;;  %v4215_v35 = vld [vmem:[#allocation10 + $0x4f4] ss:$24 sps:$4 sm:$0xff]  }
 0x2cd   :  { %v4564_v44 = vpop.f32.mrf.mxu1  ;;  %3073 = vmatprep.subr.bf16.mxu0 %v4143_v37  ;;  %3098 = vmatprep.subr.bf16.mxu1 %v4146_v38  ;;  %v4218_v36 = vld [vmem:[#allocation10 + $0x674] ss:$24 sps:$4 sm:$0xff]   ;;  %v4213_v37 = vld [vmem:[#allocation10 + $0x4f0] ss:$24 sps:$4 sm:$0xff]  }
 0x2ce   :  { %3128 = vmatprep.mubr.bf16.mxu1 %v4523_v13  ;;  %v4159_v13 = vld [vmem:[#allocation10 + $0x220] ss:$24 sps:$4 sm:$0xff]   ;;  %v4216_v38 = vld [vmem:[#allocation10 + $0x670] ss:$24 sps:$4 sm:$0xff]  }
 0x2cf   :  { %v1366_v46 = vpop.f32.mrf.mxu1 }
 0x2d0   :  { %3074 = vmatpush2.bf16.msra.mxu0 %v4141_v41  ;;  %3099 = vmatpush1.bf16.msra.mxu1 %v4144_v42  ;;  %v4221_v41 = vld [vmem:[#allocation10 + $0x4c4] ss:$24 sps:$4 sm:$0xff]   ;;  %v4227_v46 = vld [vmem:[#allocation10 + $0x494] ss:$24 sps:$4 sm:$0xff]  }
 0x2d1   :  { %v1367_v50 = vpop.f32.mrf.mxu1  ;;  %3075 = vmatprep.subr.bf16.mxu0 %v4149_v45  ;;  %3100 = vmatprep.subr.bf16.mxu1 %v4152_v62  ;;  %v4224_v42 = vld [vmem:[#allocation10 + $0x644] ss:$24 sps:$4 sm:$0xff]   ;;  %v4219_v45 = vld [vmem:[#allocation10 + $0x4c0] ss:$24 sps:$4 sm:$0xff]  }
 0x2d2   :  { %v4222_v62 = vld [vmem:[#allocation10 + $0x640] ss:$24 sps:$4 sm:$0xff]   ;;  %v4228_v50 = vld [vmem:[#allocation10 + $0x610] ss:$24 sps:$4 sm:$0xff]  }
 0x2d4   :  { %3076 = vmatpush2.bf16.msra.mxu0 %v4147_v48  ;;  %3101 = vmatpush1.bf16.msra.mxu1 %v4150_v49  ;;  %v4230_v48 = vld [vmem:[#allocation10 + $0x614] ss:$24 sps:$4 sm:$0xff]   ;;  %v4225_v49 = vld [vmem:[#allocation10 + $0x490] ss:$24 sps:$4 sm:$0xff]  }
 0x2d5   :  { %3077 = vmatprep.subr.bf16.mxu0 %v4155_v51  ;;  %3102 = vmatprep.subr.bf16.mxu1 %v4158_v52  ;;  %v4233_v51 = vld [vmem:[#allocation10 + $0x8e4] ss:$24 sps:$4 sm:$0xff]   ;;  %v4231_v52 = vld [vmem:[#allocation10 + $0x8e0] ss:$24 sps:$4 sm:$0xff]  }
 0x2d8   :  { %3078 = vmatpush2.bf16.msra.mxu0 %v4153_v0  ;;  %3103 = vmatpush1.bf16.msra.mxu1 %v4156_v53  ;;  %v4236_v0 = vld [vmem:[#allocation10 + $0x8b4] ss:$24 sps:$4 sm:$0xff]  }
 0x2d9   :  { %3079 = vmatprep.subr.bf16.mxu0 %v4161_v54  ;;  %3104 = vmatprep.subr.bf16.mxu1 %v4164_v55  ;;  %v4234_v54 = vld [vmem:[#allocation10 + $0x8b0] ss:$24 sps:$4 sm:$0xff]  }
 0x2dc   :  { %3080 = vmatpush2.bf16.msra.mxu0 %v4159_v13  ;;  %3105 = vmatpush1.bf16.msra.mxu1 %v4162_v56  ;;  %v4239_v13 = vld [vmem:[#allocation10 + $0x884] ss:$24 sps:$4 sm:$0xff]  }
 0x2dd   :  { %3081 = vmatprep.subr.bf16.mxu0 %v4167_v4  ;;  %3106 = vmatprep.subr.bf16.mxu1 %v4170_v57  ;;  %v4237_v4 = vld [vmem:[#allocation10 + $0x880] ss:$24 sps:$4 sm:$0xff]   ;;  %v4242_v57 = vld [vmem:[#allocation10 + $0x854] ss:$24 sps:$4 sm:$0xff]  }
 0x2e0   :  { %3082 = vmatpush2.bf16.msra.mxu0 %v4165_v60  ;;  %3107 = vmatpush1.bf16.msra.mxu1 %v4168_v61  ;;  %v4240_v61 = vld [vmem:[#allocation10 + $0x850] ss:$24 sps:$4 sm:$0xff]  }
 0x2e1   :  { %3083 = vmatprep.subr.bf16.mxu0 %v4173_v3  ;;  %3108 = vmatprep.subr.bf16.mxu1 %v4176_v5  ;;  %v4245_v3 = vld [vmem:[#allocation10 + $0x824] ss:$24 sps:$4 sm:$0xff]   ;;  %v4243_v5 = vld [vmem:[#allocation10 + $0x820] ss:$24 sps:$4 sm:$0xff]  }
 0x2e4   :  { %3084 = vmatpush2.bf16.msra.mxu0 %v4171_v6  ;;  %3109 = vmatpush1.bf16.msra.mxu1 %v4174_v8  ;;  %v4248_v6 = vld [vmem:[#allocation10 + $0x7f4] ss:$24 sps:$4 sm:$0xff]   ;;  %v4251_v8 = vld [vmem:[#allocation10 + $0x7c4] ss:$24 sps:$4 sm:$0xff]  }
 0x2e5   :  { %3085 = vmatprep.subr.bf16.mxu0 %v4179_v9  ;;  %3110 = vmatprep.subr.bf16.mxu1 %v4182_v10  ;;  %v3180_v9 = vlaneseq  ;;  %v4249_v10 = vld [vmem:[#allocation10 + $0x7c0] ss:$24 sps:$4 sm:$0xff]  }
 0x2e8   :  { %3086 = vmatpush2.bf16.msra.mxu0 %v4177_v11  ;;  %3111 = vmatpush1.bf16.msra.mxu1 %v4180_v12  ;;  %v4254_v11 = vld [vmem:[#allocation10 + $0x794] ss:$24 sps:$4 sm:$0xff]   ;;  %v4574_v12 = vshrl.u32 %v3180_v9, 7 }
 0x2e9   :  { %3112 = vmatprep.subr.bf16.mxu1 %v4185_v14  ;;  %3137 = vmatprep.subr.bf16.mxu0 %v4188_v15  ;;  %v4252_v14 = vld [vmem:[#allocation10 + $0x790] ss:$24 sps:$4 sm:$0xff]  }
 0x2ea   :  { %v3182_v15 = vsub.s32 0, %v4574_v12 }
 0x2eb   :  { %v4567_v7 = vpop.f32.mrf.mxu0  ;;  %3088 = vmatmul.mubr.bf16.vlgmr.msra.gmra.mxu0 %v4529_v43  ;;  %v4203_v43 = vld [vmem:[#allocation10 + $0x554] ss:$24 sps:$4 sm:$0xff]  }
 0x2ec   :  { %3113 = vmatpush2.bf16.msra.mxu1 %v4183_v17  ;;  %3138 = vmatpush1.bf16.msra.mxu0 %v4186_v18  ;;  %v4577_v17 = vld [vmem:[#allocation11] sm:$0x3f]  ;;  %v2844_v18 = vadd.f32 %v4567_v7, %v4552_v58 }
 0x2ed   :  { %v4570_v22 = vpop.f32.mrf.mxu0  ;;  %3114 = vmatprep.subr.bf16.mxu1 %v4191_v19  ;;  %3139 = vmatprep.subr.bf16.mxu0 %v4194_v40  ;;  %v3186_v19 = vsub.s32 1, %v4574_v12 }
 0x2ee   :  { %3169 = vmatprep.mubr.bf16.mxu0 %v4533_v47  ;;  %v4207_v47 = vld [vmem:[#allocation10 + $0x520] ss:$24 sps:$4 sm:$0xff]   ;;  %v2846_v40 = vadd.f32 %v4570_v22, %v4556_v63 }
 0x2ef   :  { %v2847_v24 = vpop.f32.mrf.mxu0 }
 0x2f0   :  { %3115 = vmatpush2.bf16.msra.mxu1 %v4189_v20  ;;  %3140 = vmatpush1.bf16.msra.mxu0 %v4192_v21  ;;  %v3183_v21 = vrot.slane %v4577_v17, %v3182_v15 }
 0x2f1   :  { %v2848_v27 = vpop.f32.mrf.mxu0  ;;  %3116 = vmatprep.subr.bf16.mxu1 %v4197_v23  ;;  %3141 = vmatprep.subr.bf16.mxu0 %v4200_v33 }
 0x2f4   :  { %3117 = vmatpush2.bf16.msra.mxu1 %v4195_v25  ;;  %3142 = vmatpush1.bf16.msra.mxu0 %v4198_v26  ;;  %v3187_v25 = vrot.slane %v4577_v17, %v3186_v19 }
 0x2f5   :  { %3118 = vmatprep.subr.bf16.mxu1 %v4203_v43  ;;  %3143 = vmatprep.subr.bf16.mxu0 %v4206_v28 }
 0x2f8   :  { %3119 = vmatpush2.bf16.msra.mxu1 %v4201_v29  ;;  %3144 = vmatpush1.bf16.msra.mxu0 %v4204_v30 }
 0x2f9   :  { %3120 = vmatprep.subr.bf16.mxu1 %v4209_v31  ;;  %3145 = vmatprep.subr.bf16.mxu0 %v4212_v32 }
 0x2fc   :  { %3121 = vmatpush2.bf16.msra.mxu1 %v4207_v47  ;;  %3146 = vmatpush1.bf16.msra.mxu0 %v4210_v34  ;;  %v3190_v34 = vsub.s32 2, %v4574_v12 }
 0x2fd   :  { %3122 = vmatprep.subr.bf16.mxu1 %v4215_v35  ;;  %3147 = vmatprep.subr.bf16.mxu0 %v4218_v36  ;;  %v3194_v36 = vsub.s32 3, %v4574_v12 }
 0x300   :  { %3123 = vmatpush2.bf16.msra.mxu1 %v4213_v37  ;;  %3148 = vmatpush1.bf16.msra.mxu0 %v4216_v38 }
 0x301   :  { %3124 = vmatprep.subr.bf16.mxu1 %v4221_v41  ;;  %3149 = vmatprep.subr.bf16.mxu0 %v4224_v42  ;;  %v3191_v41 = vrot.slane %v4577_v17, %v3190_v34 }
 0x304   :  { %3125 = vmatpush2.bf16.msra.mxu1 %v4219_v45  ;;  %3150 = vmatpush1.bf16.msra.mxu0 %v4222_v62 }
 0x305   :  { %3126 = vmatprep.subr.bf16.mxu1 %v4227_v46  ;;  %3151 = vmatprep.subr.bf16.mxu0 %v4230_v48  ;;  %v3195_v46 = vrot.slane %v4577_v17, %v3194_v36 }
 0x308   :  { %3127 = vmatpush2.bf16.msra.mxu1 %v4225_v49  ;;  %3152 = vmatpush1.bf16.msra.mxu0 %v4228_v50 }
 0x309   :  { %3153 = vmatprep.subr.bf16.mxu0 %v4233_v51 }
 0x30b   :  { %v2884_v53 = vpop.f32.mrf.mxu1  ;;  %3129 = vmatmul.mubr.bf16.vlgmr.msra.gmra.mxu1 %v4539_v16  ;;  %v4246_v16 = vld [vmem:[#allocation10 + $0x7f0] ss:$24 sps:$4 sm:$0xff]  }
 0x30c   :  { %3154 = vmatpush2.bf16.msra.mxu0 %v4231_v52  ;;  %v2885_v20 = vadd.f32 %v2884_v53, %v2844_v18 }
 0x30d   :  { %v2886_v55 = vpop.f32.mrf.mxu1  ;;  %3155 = vmatprep.subr.bf16.mxu0 %v4236_v0 }
 0x30e   :  { %v2887_v33 = vadd.f32 %v2886_v55, %v2846_v40 }
 0x30f   :  { %v2888_v56 = vpop.f32.mrf.mxu1 }
 0x310   :  { %3156 = vmatpush2.bf16.msra.mxu0 %v4234_v54 }
 0x311   :  { %3157 = vmatprep.subr.bf16.mxu0 %v4239_v13  ;;  %v2889_v60 = vpop.f32.mrf.mxu1 }
 0x314   :  { %3158 = vmatpush2.bf16.msra.mxu0 %v4237_v4 }
 0x315   :  { %3159 = vmatprep.subr.bf16.mxu0 %v4242_v57  ;;  %v3198_v57 = vsub.s32 4, %v4574_v12 }
 0x318   :  { %3160 = vmatpush2.bf16.msra.mxu0 %v4240_v61  ;;  %v3202_v61 = vsub.s32 5, %v4574_v12 }
 0x319   :  { %3161 = vmatprep.subr.bf16.mxu0 %v4245_v3 }
 0x31c   :  { %3162 = vmatpush2.bf16.msra.mxu0 %v4243_v5 }
 0x31d   :  { %3163 = vmatprep.subr.bf16.mxu0 %v4248_v6  ;;  %v3199_v6 = vrot.slane %v4577_v17, %v3198_v57 }
 0x320   :  { %3164 = vmatpush2.bf16.msra.mxu0 %v4246_v16 }
 0x321   :  { %3165 = vmatprep.subr.bf16.mxu0 %v4251_v8 }
 0x324   :  { %3166 = vmatpush2.bf16.msra.mxu0 %v4249_v10  ;;  %v3203_v10 = vrot.slane %v4577_v17, %v3202_v61 }
 0x325   :  { %3167 = vmatprep.subr.bf16.mxu0 %v4254_v11 }
 0x328   :  { %3168 = vmatpush2.bf16.msra.mxu0 %v4252_v14 }
 0x32b   :  { %v2925_v23 = vpop.f32.mrf.mxu0  ;;  %3170 = vmatmul.mubr.bf16.vlgmr.msra.gmra.mxu0 %v4545_v2 }
 0x32c   :  { %v2926_v24 = vadd.f32 %v2925_v23, %v2885_v20 }
 0x32d   :  { %v2927_v26 = vpop.f32.mrf.mxu0 }
 0x32e   :  { %v3210_v27 = vadd.f32 %v3183_v21, %v2926_v24  ;;  %v2928_v43 = vadd.f32 %v2927_v26, %v2887_v33 }
 0x32f   :  { %v2929_v58 = vpop.f32.mrf.mxu0 }
 0x330   :  { %3216 = vst [vmem:[#allocation13] sm:$0xff] %v3210_v27  ;;  %v3211_v7 = vadd.f32 %v3187_v25, %v2928_v43 }
 0x331   :  { %v2930_v28 = vpop.f32.mrf.mxu0 }
 0x332   :  { %3217 = vst [vmem:[#allocation13 + $0x8] sm:$0xff] %v3211_v7 }
 0x34b   :  { %v2966_v29 = vpop.f32.mrf.mxu1 }
 0x34c   :  { %v2967_v35 = vadd.f32 %v2966_v29, %v4554_v59 }
 0x34d   :  { %v2968_v63 = vpop.f32.mrf.mxu1 }
 0x34e   :  { %v2969_v37 = vadd.f32 %v2968_v63, %v4558_v1 }
 0x34f   :  { %v2970_v22 = vpop.f32.mrf.mxu1 }
 0x351   :  { %v2971_v30 = vpop.f32.mrf.mxu1 }
 0x36b   :  { %v3007_v31 = vpop.f32.mrf.mxu0 }
 0x36c   :  { %v3008_v38 = vadd.f32 %v3007_v31, %v2967_v35 }
 0x36d   :  { %v3009_v32 = vpop.f32.mrf.mxu0 }
 0x36e   :  { %v3010_v45 = vadd.f32 %v3009_v32, %v2969_v37 }
 0x36f   :  { %v3011_v47 = vpop.f32.mrf.mxu0 }
 0x371   :  { %v3012_v2 = vpop.f32.mrf.mxu0 }
 0x38b   :  { %v3048_v42 = vpop.f32.mrf.mxu1 }
 0x38c   :  { %v3049_v62 = vadd.f32 %v3048_v42, %v3008_v38 }
 0x38d   :  { %v3050_v48 = vpop.f32.mrf.mxu1 }
 0x38e   :  { %v3212_v49 = vadd.f32 %v3191_v41, %v3049_v62  ;;  %v3051_v50 = vadd.f32 %v3050_v48, %v3010_v45 }
 0x38f   :  { %v3052_v51 = vpop.f32.mrf.mxu1 }
 0x390   :  { %3218 = vst [vmem:[#allocation13 + $0x10] sm:$0xff] %v3212_v49  ;;  %v3213_v52 = vadd.f32 %v3195_v46, %v3051_v50 }
 0x391   :  { %v3053_v0 = vpop.f32.mrf.mxu1 }
 0x392   :  { %3219 = vst [vmem:[#allocation13 + $0x18] sm:$0xff] %v3213_v52 }
 0x3ab   :  { %v3089_v59 = vpop.f32.mrf.mxu0 }
 0x3ac   :  { %v3090_v60 = vadd.f32 %v3089_v59, %v4561_v39 }
 0x3ad   :  { %v3091_v53 = vpop.f32.mrf.mxu0 }
 0x3ae   :  { %v3092_v3 = vadd.f32 %v3091_v53, %v4564_v44 }
 0x3af   :  { %v3093_v54 = vpop.f32.mrf.mxu0 }
 0x3b1   :  { %v3094_v1 = vpop.f32.mrf.mxu0 }
 0x3cb   :  { %v3130_v55 = vpop.f32.mrf.mxu1 }
 0x3cc   :  { %v3131_v5 = vadd.f32 %v3130_v55, %v3090_v60 }
 0x3cd   :  { %v3132_v13 = vpop.f32.mrf.mxu1 }
 0x3ce   :  { %v3133_v8 = vadd.f32 %v3132_v13, %v3092_v3 }
 0x3cf   :  { %v3134_v56 = vpop.f32.mrf.mxu1 }
 0x3d1   :  { %v3135_v4 = vpop.f32.mrf.mxu1 }
 0x3eb   :  { %v3171_v16 = vpop.f32.mrf.mxu0 }
 0x3ec   :  { %v3172_v9 = vadd.f32 %v3171_v16, %v3131_v5 }
 0x3ed   :  { %v3173_v11 = vpop.f32.mrf.mxu0 }
 0x3ee   :  { %v3214_v14 = vadd.f32 %v3199_v6, %v3172_v9  ;;  %v3174_v15 = vadd.f32 %v3173_v11, %v3133_v8 }
 0x3ef   :  { %v3175_v18 = vpop.f32.mrf.mxu0 }
 0x3f0   :  { %3220 = vst [vmem:[#allocation13 + $0x20] sm:$0xff] %v3214_v14  ;;  %v3215_v39 = vadd.f32 %v3203_v10, %v3174_v15 }
 0x3f1   :  { %v3176_v12 = vpop.f32.mrf.mxu0 }
 0x3f2   :  { %3221 = vst [vmem:[#allocation13 + $0x28] sm:$0xff] %v3215_v39 }
 0x3f3   :  { %4394 = shalt.err (!%p4391_p6)
}
 0x3f4   :  { %3231 = dma.vmem_to_hbm [thread:$0]  %s3229_s5, 768, %s4608_s6, [#allocation4]  }
 0x3f5   :  { %4411 = dma.done.wait [#allocation4], 768  }
 0x3f6   :  { %4412 = vsyncadd [#allocation4], 4294966528 }
 0x3f7   :  { %3235 = vsyncpa [#allocation3], 1 }
 0x3f8   :  { %3236 = vsyncpa [#allocation6], 1 }
 0x3f9   :  { %3237 = vsyncpa [#allocation9], 1 }
 0x3fa   :  { %3238 = vsyncpa [#allocation12], 1 }
 0x3fb   :  { %3239 = vsyncpa [#allocation4], 1 }

</bundles_post_ra>
